<compile_context>
chip_gen: v5e
topology: v5e:2x2
jax: 0.10.0
libtpu: 0.0.40
codegen_flags: <defaults>
</compile_context>

<pallas_src>
import jax
import jax.numpy as jnp
from jax.experimental import pallas as pl
from jax.experimental.pallas import tpu as pltpu

SUBLANE = 8  # second-to-last-dim tiling unit for f32/bf16 batch tiles


def _round_up(n, m):
    return ((n + m - 1) // m) * m


def _default_target_steps():
    """One grid step per TensorCore: 2 on megacore parts (v4/v5p/v7x), else 1.

    On single-core chips the extra step would only add ~0.35 us of per-step
    overhead, so a wrong guess is harmless; on megacore chips two "parallel"
    steps let both TensorCores work.
    """
    try:
        kind = jax.devices()[0].device_kind.lower()
    except Exception:  # no TPU visible at trace time
        return 1
    if any(tag in kind for tag in ("v4", "v5p", "v7", "7x")):
        return 2
    return 1


def rae_classifier_kernel(x_ref, w_enc_ref, b_enc_ref, w_cls_ref, b_cls_ref,
                          out_ref):
    # x_ref:     (TILE_B, D)   bf16 (or f32) batch tile, lane-padded by Mosaic
    # w_enc_ref: (D, H)        pre-transposed encoder weights (resident)
    # b_enc_ref: (1, H)        f32
    # w_cls_ref: (H, C)        pre-transposed classifier weights (resident)
    # b_cls_ref: (1, C)        f32
    x = x_ref[...]

    # encoder: MXU-native matmul (contraction on RHS leading axis) + bias + ReLU
    h = jnp.dot(x, w_enc_ref[...], preferred_element_type=jnp.float32)
    h = jnp.maximum(h + b_enc_ref[...], 0.0)

    # classifier (feed the MXU in the operand dtype; accumulate in f32)
    logits = jnp.dot(h.astype(w_cls_ref.dtype), w_cls_ref[...],
                     preferred_element_type=jnp.float32)
    logits = logits + b_cls_ref[...]

    # softmax over the class (lane) axis, all in f32
    m = jnp.max(logits, axis=-1, keepdims=True)
    e = jnp.exp(logits - m)
    denom = jnp.sum(e, axis=-1, keepdims=True)
    r = pl.reciprocal(denom, approx=True)    # EUP estimate (free slot)
    r = r * (2.0 - denom * r)                # one Newton step -> ~f32 accuracy
    out_ref[...] = (e * r).astype(out_ref.dtype)


def rae_classifier_forward(x, w_enc, b_enc, w_cls, b_cls, *,
                           operand_dtype=jnp.bfloat16,
                           target_steps=None,
                           vmem_budget_bytes=12 * 1024 * 1024):
    """x: (B, D_in); weights in PyTorch nn.Linear layout:
    w_enc (H, D_in), b_enc (H,), w_cls (C, H), b_cls (C,).
    Returns softmax probabilities (B, C) in f32."""
    B, d_in = x.shape
    h_dim = w_enc.shape[0]
    c_dim = w_cls.shape[0]
    f32 = jnp.float32

    if target_steps is None:
        target_steps = _default_target_steps()

    # MXU operands in bf16 (halves x/weight HBM bytes, bf16-native MXU on
    # v6e/v7x, avoids multi-pass f32 matmul on v5e).  In a real pipeline the
    # producer would hand us bf16 directly; the weight transpose/cast below is
    # a one-time, few-KiB layout step.
    x_op = x.astype(operand_dtype)
    w_enc_t = jnp.transpose(w_enc).astype(operand_dtype)   # (D, H)
    w_cls_t = jnp.transpose(w_cls).astype(operand_dtype)   # (H, C)
    b_enc_r = b_enc.reshape(1, h_dim).astype(f32)
    b_cls_r = b_cls.reshape(1, c_dim).astype(f32)

    # Batch tile: cover the batch in `target_steps` steps, sublane-aligned,
    # capped so the double-buffered x/out tiles stay inside the VMEM budget
    # (keeps us under the scoped default on every generation, incl. v7x).
    x_bytes = jnp.dtype(operand_dtype).itemsize
    per_row_vmem = 2 * d_in * x_bytes + 2 * c_dim * 4     # 2x-buffered in + out
    row_cap = max(SUBLANE,
                  (vmem_budget_bytes // max(per_row_vmem, 1)) // SUBLANE * SUBLANE)
    tile_b = min(_round_up(pl.cdiv(B, max(target_steps, 1)), SUBLANE), row_cap)
    steps = pl.cdiv(B, tile_b)   # ragged last tile: OOB rows masked on store

    grid_spec = pl.GridSpec(
        grid=(steps,),
        in_specs=[
            # batch tile; last dim == full array dim -> no wrapper padding needed
            pl.BlockSpec((tile_b, d_in), lambda i: (i, 0)),
            # resident weights/biases: constant block index, fetched once; at
            # these sizes (<4 KiB) double-buffered allocation is negligible.
            pl.BlockSpec((d_in, h_dim), lambda i: (0, 0)),
            pl.BlockSpec((1, h_dim), lambda i: (0, 0)),
            pl.BlockSpec((h_dim, c_dim), lambda i: (0, 0)),
            pl.BlockSpec((1, c_dim), lambda i: (0, 0)),
        ],
        # true (B, C) output: no padded buffer, no post-kernel slice; C=8 means
        # a masked store, which is fine (vst slot has ample slack here).
        out_specs=pl.BlockSpec((tile_b, c_dim), lambda i: (i, 0)),
    )

    cost = pl.CostEstimate(
        flops=2 * B * (d_in * h_dim + h_dim * c_dim),
        transcendentals=B * (c_dim + 1),                 # exp + reciprocal seed
        bytes_accessed=(x_op.size * x_bytes
                        + (w_enc_t.size + w_cls_t.size) * x_bytes
                        + (b_enc_r.size + b_cls_r.size) * 4
                        + B * c_dim * 4),
    )

    return pl.pallas_call(
        rae_classifier_kernel,
        out_shape=jax.ShapeDtypeStruct((B, c_dim), f32),
        grid_spec=grid_spec,
        compiler_params=pltpu.CompilerParams(
            # batch axis is embarrassingly parallel -> megacore chips shard the
            # (>=2) steps across their TensorCores; single-core chips see 1 step.
            dimension_semantics=(pltpu.PARALLEL,)),
        cost_estimate=cost,
    )(x_op, w_enc_t, b_enc_r, w_cls_t, b_cls_r)


def reference_forward(x, w_enc, b_enc, w_cls, b_cls):
    h = jnp.maximum(x @ w_enc.T + b_enc, 0.0)
    logits = h @ w_cls.T + b_cls
    return jax.nn.softmax(logits, axis=-1)


if __name__ == "__main__":
    # Layer sizes consistent with the module; batching is what makes the MXU
    # do real work (the module's Linear layers are batch-agnostic).
    input_size, hidden_size, output_size = 32, 16, 8
    batch = 512

    key = jax.random.PRNGKey(0)
    k_x, k_we, k_be, k_wc, k_bc = jax.random.split(key, 5)

    x = jax.random.normal(k_x, (batch, input_size), dtype=jnp.float32)
    w_enc = jax.random.normal(k_we, (hidden_size, input_size), jnp.float32) * 0.1
    b_enc = jax.random.normal(k_be, (hidden_size,), jnp.float32) * 0.1
    w_cls = jax.random.normal(k_wc, (output_size, hidden_size), jnp.float32) * 0.1
    b_cls = jax.random.normal(k_bc, (output_size,), jnp.float32) * 0.1

    ref = reference_forward(x, w_enc, b_enc, w_cls, b_cls)

    # Default bf16-operand path (loosened tolerance per review).
    out = jax.block_until_ready(
        rae_classifier_forward(x, w_enc, b_enc, w_cls, b_cls))
    assert out.shape == (batch, output_size)
    assert jnp.allclose(out, ref, atol=2e-2), "bf16 path mismatch vs reference"
    assert jnp.allclose(jnp.sum(out, axis=-1), 1.0, atol=1e-4)

    # Full-f32 operand path keeps the original tight tolerance.
    out32 = jax.block_until_ready(rae_classifier_forward(
        x, w_enc, b_enc, w_cls, b_cls, operand_dtype=jnp.float32))
    assert jnp.allclose(out32, ref, atol=1e-5, rtol=1e-5), "f32 path mismatch"

    # Ragged batch (not a multiple of the tile) and the module's single-sample
    # online-learning path: handled by masked stores on the last tile, no
    # wrapper padding and no post-kernel slicing.
    for bsub in (100, 1):
        o = jax.block_until_ready(rae_classifier_forward(
            x[:bsub], w_enc, b_enc, w_cls, b_cls, operand_dtype=jnp.float32))
        r = reference_forward(x[:bsub], w_enc, b_enc, w_cls, b_cls)
        assert o.shape == (bsub, output_size)
        assert jnp.allclose(o, r, atol=1e-5, rtol=1e-5), f"mismatch at B={bsub}"

    # TODO(synk): the error_signal / sparsity-mask branch of ReactiveAutoencoder
    # (autograd on the reconstruction loss inside a classifier weight-grad hook)
    # is a training-time hook, not part of RAEClassifier.forward, so it is not
    # implemented here.
    print("KERNEL_OK")
</pallas_src>

<mosaic_0001>
module attributes {stable_mosaic.version = 11 : i64} {
  func.func @rae_classifier_kernel(%arg0: i32, %arg1: memref<512x32xbf16, #tpu.memory_space<vmem>>, %arg2: memref<32x16xbf16, #tpu.memory_space<vmem>>, %arg3: memref<1x16xf32, #tpu.memory_space<vmem>>, %arg4: memref<16x8xbf16, #tpu.memory_space<vmem>>, %arg5: memref<1x8xf32, #tpu.memory_space<vmem>>, %arg6: memref<512x8xf32, #tpu.memory_space<vmem>>) attributes {dimension_semantics = [#tpu.dimension_semantics<parallel>], iteration_bounds = array<i64: 1>, scalar_prefetch = 0 : i64, scratch_operands = 0 : i64, tpu.core_type = #tpu.core_type<tc>, window_params = [{transform_indices = @transform_0, window_bounds = array<i64: 512, 32>}, {pipeline_mode = #tpu.pipeline_mode<synchronous>, transform_indices = @transform_1, window_bounds = array<i64: 32, 16>}, {pipeline_mode = #tpu.pipeline_mode<synchronous>, transform_indices = @transform_2, window_bounds = array<i64: 1, 16>}, {pipeline_mode = #tpu.pipeline_mode<synchronous>, transform_indices = @transform_3, window_bounds = array<i64: 16, 8>}, {pipeline_mode = #tpu.pipeline_mode<synchronous>, transform_indices = @transform_4, window_bounds = array<i64: 1, 8>}, {transform_indices = @transform_5, window_bounds = array<i64: 512, 8>}]} {
    %c0 = arith.constant 0 : index
    %c0_0 = arith.constant 0 : index
    %0 = vector.load %arg1[%c0, %c0_0] : memref<512x32xbf16, #tpu.memory_space<vmem>>, vector<512x32xbf16>
    %c0_1 = arith.constant 0 : index
    %c0_2 = arith.constant 0 : index
    %1 = vector.load %arg2[%c0_1, %c0_2] : memref<32x16xbf16, #tpu.memory_space<vmem>>, vector<32x16xbf16>
    %cst = arith.constant dense<0.000000e+00> : vector<512x16xf32>
    %2 = tpu.matmul %0, %1, %cst {dimension_numbers = #tpu.dot_dimension_numbers<[1], [0], [0], [1], [0, 0, 1, 1], [], []>} : vector<512x32xbf16>, vector<32x16xbf16>, vector<512x16xf32> -> vector<512x16xf32>
    %c0_3 = arith.constant 0 : index
    %c0_4 = arith.constant 0 : index
    %3 = vector.load %arg3[%c0_3, %c0_4] : memref<1x16xf32, #tpu.memory_space<vmem>>, vector<1x16xf32>
    %4 = vector.broadcast %3 : vector<1x16xf32> to vector<512x16xf32>
    %5 = arith.addf %2, %4 : vector<512x16xf32>
    %cst_5 = arith.constant 0.000000e+00 : f32
    %6 = vector.broadcast %cst_5 : f32 to vector<512x16xf32>
    %7 = arith.maximumf %5, %6 : vector<512x16xf32>
    %8 = arith.truncf %7 : vector<512x16xf32> to vector<512x16xbf16>
    %c0_6 = arith.constant 0 : index
    %c0_7 = arith.constant 0 : index
    %9 = vector.load %arg4[%c0_6, %c0_7] : memref<16x8xbf16, #tpu.memory_space<vmem>>, vector<16x8xbf16>
    %cst_8 = arith.constant dense<0.000000e+00> : vector<512x8xf32>
    %10 = tpu.matmul %8, %9, %cst_8 {dimension_numbers = #tpu.dot_dimension_numbers<[1], [0], [0], [1], [0, 0, 1, 1], [], []>} : vector<512x16xbf16>, vector<16x8xbf16>, vector<512x8xf32> -> vector<512x8xf32>
    %c0_9 = arith.constant 0 : index
    %c0_10 = arith.constant 0 : index
    %11 = vector.load %arg5[%c0_9, %c0_10] : memref<1x8xf32, #tpu.memory_space<vmem>>, vector<1x8xf32>
    %12 = vector.broadcast %11 : vector<1x8xf32> to vector<512x8xf32>
    %13 = arith.addf %10, %12 : vector<512x8xf32>
    %cst_11 = arith.constant dense<0xFF800000> : vector<512xf32>
    %14 = vector.multi_reduction <maximumf>, %13, %cst_11 [1] : vector<512x8xf32> to vector<512xf32>
    %15 = vector.shape_cast %14 : vector<512xf32> to vector<512x1xf32>
    %16 = vector.broadcast %15 : vector<512x1xf32> to vector<512x8xf32>
    %17 = arith.subf %13, %16 : vector<512x8xf32>
    %18 = math.exp %17 : vector<512x8xf32>
    %cst_12 = arith.constant dense<0.000000e+00> : vector<512xf32>
    %19 = vector.multi_reduction <add>, %18, %cst_12 [1] : vector<512x8xf32> to vector<512xf32>
    %20 = vector.shape_cast %19 : vector<512xf32> to vector<512x1xf32>
    %21 = tpu.reciprocal %20 {approx = true} : vector<512x1xf32> -> vector<512x1xf32>
    %22 = arith.mulf %20, %21 : vector<512x1xf32>
    %cst_13 = arith.constant 2.000000e+00 : f32
    %23 = vector.broadcast %cst_13 : f32 to vector<512x1xf32>
    %24 = arith.subf %23, %22 : vector<512x1xf32>
    %25 = arith.mulf %21, %24 : vector<512x1xf32>
    %26 = vector.broadcast %25 : vector<512x1xf32> to vector<512x8xf32>
    %27 = arith.mulf %18, %26 : vector<512x8xf32>
    %c0_14 = arith.constant 0 : index
    %c0_15 = arith.constant 0 : index
    %28 = vector.load %arg6[%c0_14, %c0_15] : memref<512x8xf32, #tpu.memory_space<vmem>>, vector<512x8xf32>
    tpu.vector_store %arg6[%c0_14, %c0_15], %27 {strides = array<i32>} : memref<512x8xf32, #tpu.memory_space<vmem>>, vector<512x8xf32>,
    return
  }
  func.func @transform_0(%arg0: i32) -> (i32, i32) {
    %c0_i32 = arith.constant 0 : i32
    %c0_i32_0 = arith.constant 0 : i32
    return %arg0, %c0_i32 : i32, i32
  }
  func.func @transform_1(%arg0: i32) -> (i32, i32) {
    %c0_i32 = arith.constant 0 : i32
    %c0_i32_0 = arith.constant 0 : i32
    %c0_i32_1 = arith.constant 0 : i32
    return %c0_i32, %c0_i32_0 : i32, i32
  }
  func.func @transform_2(%arg0: i32) -> (i32, i32) {
    %c0_i32 = arith.constant 0 : i32
    %c0_i32_0 = arith.constant 0 : i32
    %c0_i32_1 = arith.constant 0 : i32
    return %c0_i32, %c0_i32_0 : i32, i32
  }
  func.func @transform_3(%arg0: i32) -> (i32, i32) {
    %c0_i32 = arith.constant 0 : i32
    %c0_i32_0 = arith.constant 0 : i32
    %c0_i32_1 = arith.constant 0 : i32
    return %c0_i32, %c0_i32_0 : i32, i32
  }
  func.func @transform_4(%arg0: i32) -> (i32, i32) {
    %c0_i32 = arith.constant 0 : i32
    %c0_i32_0 = arith.constant 0 : i32
    %c0_i32_1 = arith.constant 0 : i32
    return %c0_i32, %c0_i32_0 : i32, i32
  }
  func.func @transform_5(%arg0: i32) -> (i32, i32) {
    %c0_i32 = arith.constant 0 : i32
    %c0_i32_0 = arith.constant 0 : i32
    return %arg0, %c0_i32 : i32, i32
  }
}

</mosaic_0001>

<bundles_post_ra>
// kernel: tpu_custom_call.1
= control target key start
LH: loop header
LB: loop body
LE: loop exit
PB: predicated region body
PF: predicated region fallthrough
CT: control target
= control target key end

     0   :  { %vm265_vm0 = vcmask 261120   ;;  %vm639_vm1 = vcmask 130048   ;;  %vm905_vm2 = vcmask 64512   ;;  %s3663_s1 = inlined_call_operand.vmem [shape: bf16[32,16], index: 1, kind: input, shape index: {}]   ;;  %s3664_s2 = inlined_call_operand.vmem [shape: f32[1,16], index: 2, kind: input, shape index: {}]   ;;  %s3665_s0 = inlined_call_operand.vmem [shape: bf16[512,32], index: 0, kind: input, shape index: {}]   ;;  %s3666_s3 = inlined_call_operand.vmem [shape: bf16[16,8], index: 3, kind: input, shape index: {}]   ;;  %s3667_s4 = inlined_call_operand.vmem [shape: f32[1,8], index: 4, kind: input, shape index: {}]   ;;  %s3668_s5 = inlined_call_operand.vmem [shape: f32[512,8], index: 5, kind: output, shape index: {}]  }
   0x1   :  { %v2107_v0 = vld [vmem:[%s3663_s1 + $0x8] sm:$0xff]  ;;  %v2106_v1 = vld [vmem:[%s3663_s1] sm:$0xff]  ;;  %v2076_v6 = vld [vmem:[%s3665_s0 + $0x10] sm:$0xff] }
   0x2   :  { %368 = vmatpush.bf16.msra.mxu0 %v2107_v0  ;;  %2109 = vmatpush.bf16.msra.mxu2 %v2107_v0  ;;  %v2074_v2 = vld [vmem:[%s3665_s0] sm:$0xff]  ;;  %v2075_v4 = vld [vmem:[%s3665_s0 + $0x8] sm:$0xff]  ;;  %v2092_v7 = vld [vmem:[%s3665_s0 + $0x90] sm:$0xff] }
   0x3   :  { %v2090_v3 = vld [vmem:[%s3665_s0 + $0x80] sm:$0xff]  ;;  %v2091_v5 = vld [vmem:[%s3665_s0 + $0x88] sm:$0xff]  ;;  %v2077_v8 = vld [vmem:[%s3665_s0 + $0x18] sm:$0xff] }
   0x4   :  { %v2093_v9 = vld [vmem:[%s3665_s0 + $0x98] sm:$0xff]  ;;  %v2078_v10 = vld [vmem:[%s3665_s0 + $0x20] sm:$0xff]  ;;  %v2079_v12 = vld [vmem:[%s3665_s0 + $0x28] sm:$0xff] }
   0x5   :  { %v2094_v11 = vld [vmem:[%s3665_s0 + $0xa0] sm:$0xff]  ;;  %v2095_v13 = vld [vmem:[%s3665_s0 + $0xa8] sm:$0xff]  ;;  %v2080_v14 = vld [vmem:[%s3665_s0 + $0x30] sm:$0xff] }
   0x6   :  { %369 = vmatpush.bf16.msra.mxu0 %v2106_v1  ;;  %2110 = vmatpush.bf16.msra.mxu2 %v2106_v1  ;;  %v2096_v15 = vld [vmem:[%s3665_s0 + $0xb0] sm:$0xff]  ;;  %v2108_v16 = vld [vmem:[%s3666_s3] sm:$0xff]  ;;  %v2081_v17 = vld [vmem:[%s3665_s0 + $0x38] sm:$0xff] }
   0x7   :  { %743 = vmatpush.bf16.msra.mxu1 %v2108_v16  ;;  %2111 = vmatpush.bf16.msra.mxu3 %v2108_v16  ;;  %v2097_v18 = vld [vmem:[%s3665_s0 + $0xb8] sm:$0xff]  ;;  %v2082_v19 = vld [vmem:[%s3665_s0 + $0x40] sm:$0xff]  ;;  %v2083_v33 = vld [vmem:[%s3665_s0 + $0x48] sm:$0xff] }
   0x8   :  { %v2098_v20 = vld [vmem:[%s3665_s0 + $0xc0] sm:$0xff]  ;;  %v2099_v34 = vld [vmem:[%s3665_s0 + $0xc8] sm:$0xff]  ;;  %v2084_v49 = vld [vmem:[%s3665_s0 + $0x50] sm:$0xff] }
   0x9   :  { %2006 = vmatmul.msk.bf16.vlgmr.msra.gmra.mxu0 %vm265_vm0, %v2074_v2  ;;  %2022 = vmatmul.msk.bf16.vlgmr.msra.gmra.mxu2 %vm265_vm0, %v2090_v3  ;;  %v2483_v22 = vld [vmem:[%s3664_s2] ss:$0 sm:$0xff]  ;;  %v2100_v50 = vld [vmem:[%s3665_s0 + $0xd0] sm:$0xff]  ;;  %v2085_v1 = vld [vmem:[%s3665_s0 + $0x58] sm:$0xff] }
   0xa   :  { %v2101_v2 = vld [vmem:[%s3665_s0 + $0xd8] sm:$0xff] }
  0x19   :  { %2007 = vmatmul.msk.bf16.gmra.mxu0 %vm265_vm0, %v2075_v4  ;;  %2023 = vmatmul.msk.bf16.gmra.mxu2 %vm265_vm0, %v2091_v5 }
  0x29   :  { %2008 = vmatmul.msk.bf16.gmra.mxu0 %vm265_vm0, %v2076_v6  ;;  %2024 = vmatmul.msk.bf16.gmra.mxu2 %vm265_vm0, %v2092_v7 }
  0x39   :  { %2009 = vmatmul.msk.bf16.gmra.mxu0 %vm265_vm0, %v2077_v8  ;;  %2025 = vmatmul.msk.bf16.gmra.mxu2 %vm265_vm0, %v2093_v9 }
  0x49   :  { %2010 = vmatmul.msk.bf16.gmra.mxu0 %vm265_vm0, %v2078_v10  ;;  %2026 = vmatmul.msk.bf16.gmra.mxu2 %vm265_vm0, %v2094_v11 }
  0x59   :  { %2011 = vmatmul.msk.bf16.gmra.mxu0 %vm265_vm0, %v2079_v12  ;;  %2027 = vmatmul.msk.bf16.gmra.mxu2 %vm265_vm0, %v2095_v13 }
  0x69   :  { %2012 = vmatmul.msk.bf16.gmra.mxu0 %vm265_vm0, %v2080_v14  ;;  %2028 = vmatmul.msk.bf16.gmra.mxu2 %vm265_vm0, %v2096_v15 }
  0x79   :  { %2013 = vmatmul.msk.bf16.gmra.mxu0 %vm265_vm0, %v2081_v17  ;;  %2029 = vmatmul.msk.bf16.gmra.mxu2 %vm265_vm0, %v2097_v18  ;;  %v2086_v17 = vld [vmem:[%s3665_s0 + $0x60] sm:$0xff] }
  0x7a   :  { %v2102_v18 = vld [vmem:[%s3665_s0 + $0xe0] sm:$0xff] }
  0x86   :  { %v371_v21 = vpop.f32.mrf.mxu0 }
  0x87   :  { %v372_v24 = vadd.f32 %v2483_v22, %v371_v21 }
  0x89   :  { %2014 = vmatmul.msk.bf16.gmra.mxu0 %vm265_vm0, %v2082_v19  ;;  %2030 = vmatmul.msk.bf16.gmra.mxu2 %vm265_vm0, %v2098_v20  ;;  %v531_v27 = vmax.f32 %v372_v24, 0.0 }
  0x8c   :  { %v451_v23 = vpop.f32.mrf.mxu2 }
  0x8d   :  { %v452_v29 = vadd.f32 %v2483_v22, %v451_v23 }
  0x8e   :  { %v373_v25 = vpop.f32.mrf.mxu0 }
  0x8f   :  { %v374_v26 = vadd.f32 %v2483_v22, %v373_v25  ;;  %v563_v36 = vmax.f32 %v452_v29, 0.0 }
  0x91   :  { %v532_v28 = vmax.f32 %v374_v26, 0.0 }
  0x93   :  { %v595_v30 = vpack.c.bf16 %v532_v28, %v531_v27 }
  0x94   :  { %v453_v31 = vpop.f32.mrf.mxu2 }
  0x95   :  { %v454_v32 = vadd.f32 %v2483_v22, %v453_v31  ;;  %2042 = vmatmul.msk.bf16.vlgmr.msra.gmra.mxu1 %vm639_vm1, %v595_v30 }
  0x96   :  { %v376_v35 = vpop.f32.mrf.mxu0 }
  0x97   :  { %v564_v37 = vmax.f32 %v454_v32, 0.0  ;;  %v377_v40 = vadd.f32 %v2483_v22, %v376_v35  ;;  %v2103_v35 = vld [vmem:[%s3665_s0 + $0xe8] sm:$0xff] }
  0x99   :  { %v2498_v38 = vpack.c.bf16 %v564_v37, %v563_v36  ;;  %2015 = vmatmul.msk.bf16.gmra.mxu0 %vm265_vm0, %v2083_v33  ;;  %2031 = vmatmul.msk.bf16.gmra.mxu2 %vm265_vm0, %v2099_v34  ;;  %v533_v43 = vmax.f32 %v377_v40, 0.0  ;;  %v2087_v34 = vld [vmem:[%s3665_s0 + $0x68] sm:$0xff] }
  0x9c   :  { %v456_v39 = vpop.f32.mrf.mxu2 }
  0x9d   :  { %v457_v45 = vadd.f32 %v2483_v22, %v456_v39 }
  0x9e   :  { %v378_v41 = vpop.f32.mrf.mxu0 }
  0x9f   :  { %v379_v42 = vadd.f32 %v2483_v22, %v378_v41  ;;  %v565_v52 = vmax.f32 %v457_v45, 0.0 }
  0xa1   :  { %v534_v44 = vmax.f32 %v379_v42, 0.0 }
  0xa3   :  { %v596_v46 = vpack.c.bf16 %v534_v44, %v533_v43 }
  0xa4   :  { %v458_v47 = vpop.f32.mrf.mxu2 }
  0xa5   :  { %v459_v48 = vadd.f32 %v2483_v22, %v458_v47  ;;  %2043 = vmatmul.msk.bf16.gmra.mxu1 %vm639_vm1, %v596_v46 }
  0xa6   :  { %v381_v51 = vpop.f32.mrf.mxu0 }
  0xa7   :  { %v566_v53 = vmax.f32 %v459_v48, 0.0  ;;  %v382_v56 = vadd.f32 %v2483_v22, %v381_v51  ;;  %v2088_v51 = vld [vmem:[%s3665_s0 + $0x70] sm:$0xff] }
  0xa9   :  { %2016 = vmatmul.msk.bf16.gmra.mxu0 %vm265_vm0, %v2084_v49  ;;  %2032 = vmatmul.msk.bf16.gmra.mxu2 %vm265_vm0, %v2100_v50  ;;  %v612_v54 = vpack.c.bf16 %v566_v53, %v565_v52  ;;  %v535_v59 = vmax.f32 %v382_v56, 0.0  ;;  %v2104_v52 = vld [vmem:[%s3665_s0 + $0xf0] sm:$0xff] }
  0xab   :  { %2059 = vmatmul.msk.bf16.vlgmr.msra.gmra.mxu3 %vm639_vm1, %v612_v54 }
  0xac   :  { %v461_v55 = vpop.f32.mrf.mxu2 }
  0xad   :  { %v462_v61 = vadd.f32 %v2483_v22, %v461_v55 }
  0xae   :  { %v383_v57 = vpop.f32.mrf.mxu0 }
  0xaf   :  { %v384_v58 = vadd.f32 %v2483_v22, %v383_v57  ;;  %v567_v4 = vmax.f32 %v462_v61, 0.0 }
  0xb1   :  { %v536_v60 = vmax.f32 %v384_v58, 0.0 }
  0xb3   :  { %v597_v62 = vpack.c.bf16 %v536_v60, %v535_v59 }
  0xb4   :  { %v463_v63 = vpop.f32.mrf.mxu2 }
  0xb5   :  { %v464_v0 = vadd.f32 %v2483_v22, %v463_v63  ;;  %2044 = vmatmul.msk.bf16.gmra.mxu1 %vm639_vm1, %v597_v62 }
  0xb6   :  { %v386_v3 = vpop.f32.mrf.mxu0 }
  0xb7   :  { %v568_v5 = vmax.f32 %v464_v0, 0.0  ;;  %v387_v8 = vadd.f32 %v2483_v22, %v386_v3  ;;  %v2089_v3 = vld [vmem:[%s3665_s0 + $0x78] sm:$0xff] }
  0xb9   :  { %2017 = vmatmul.msk.bf16.gmra.mxu0 %vm265_vm0, %v2085_v1  ;;  %2033 = vmatmul.msk.bf16.gmra.mxu2 %vm265_vm0, %v2101_v2  ;;  %v613_v6 = vpack.c.bf16 %v568_v5, %v567_v4  ;;  %v537_v11 = vmax.f32 %v387_v8, 0.0  ;;  %v2105_v4 = vld [vmem:[%s3665_s0 + $0xf8] sm:$0xff] }
  0xbb   :  { %2060 = vmatmul.msk.bf16.gmra.mxu3 %vm639_vm1, %v613_v6 }
  0xbc   :  { %v466_v7 = vpop.f32.mrf.mxu2 }
  0xbd   :  { %v467_v13 = vadd.f32 %v2483_v22, %v466_v7 }
  0xbe   :  { %v388_v9 = vpop.f32.mrf.mxu0 }
  0xbf   :  { %v389_v10 = vadd.f32 %v2483_v22, %v388_v9  ;;  %v569_v20 = vmax.f32 %v467_v13, 0.0 }
  0xc1   :  { %v538_v12 = vmax.f32 %v389_v10, 0.0 }
  0xc3   :  { %v598_v14 = vpack.c.bf16 %v538_v12, %v537_v11 }
  0xc4   :  { %v468_v15 = vpop.f32.mrf.mxu2 }
  0xc5   :  { %v469_v16 = vadd.f32 %v2483_v22, %v468_v15  ;;  %2045 = vmatmul.msk.bf16.gmra.mxu1 %vm639_vm1, %v598_v14 }
  0xc6   :  { %v391_v19 = vpop.f32.mrf.mxu0 }
  0xc7   :  { %v570_v21 = vmax.f32 %v469_v16, 0.0  ;;  %v392_v25 = vadd.f32 %v2483_v22, %v391_v19 }
  0xc9   :  { %2018 = vmatmul.msk.bf16.gmra.mxu0 %vm265_vm0, %v2086_v17  ;;  %2034 = vmatmul.msk.bf16.gmra.mxu2 %vm265_vm0, %v2102_v18  ;;  %v614_v23 = vpack.c.bf16 %v570_v21, %v569_v20  ;;  %v539_v28 = vmax.f32 %v392_v25, 0.0 }
  0xcb   :  { %2061 = vmatmul.msk.bf16.gmra.mxu3 %vm639_vm1, %v614_v23 }
  0xcc   :  { %v471_v24 = vpop.f32.mrf.mxu2 }
  0xcd   :  { %v472_v30 = vadd.f32 %v2483_v22, %v471_v24 }
  0xce   :  { %v393_v26 = vpop.f32.mrf.mxu0 }
  0xcf   :  { %v394_v27 = vadd.f32 %v2483_v22, %v393_v26  ;;  %v571_v37 = vmax.f32 %v472_v30, 0.0 }
  0xd1   :  { %v540_v29 = vmax.f32 %v394_v27, 0.0 }
  0xd3   :  { %v599_v31 = vpack.c.bf16 %v540_v29, %v539_v28  ;;  %v2597_v28 = vld [vmem:[%s3667_s4] ss:$0 sm:$0xff] }
  0xd4   :  { %v473_v32 = vpop.f32.mrf.mxu2 }
  0xd5   :  { %v474_v33 = vadd.f32 %v2483_v22, %v473_v32  ;;  %2046 = vmatmul.msk.bf16.gmra.mxu1 %vm639_vm1, %v599_v31 }
  0xd6   :  { %v396_v36 = vpop.f32.mrf.mxu0 }
  0xd7   :  { %v572_v39 = vmax.f32 %v474_v33, 0.0  ;;  %v397_v42 = vadd.f32 %v2483_v22, %v396_v36 }
  0xd9   :  { %v615_v40 = vpack.c.bf16 %v572_v39, %v571_v37  ;;  %2019 = vmatmul.msk.bf16.gmra.mxu0 %vm265_vm0, %v2087_v34  ;;  %2035 = vmatmul.msk.bf16.gmra.mxu2 %vm265_vm0, %v2103_v35  ;;  %v541_v45 = vmax.f32 %v397_v42, 0.0 }
  0xdb   :  { %2062 = vmatmul.msk.bf16.gmra.mxu3 %vm639_vm1, %v615_v40 }
  0xdc   :  { %v476_v41 = vpop.f32.mrf.mxu2 }
  0xdd   :  { %v477_v47 = vadd.f32 %v2483_v22, %v476_v41 }
  0xde   :  { %v398_v43 = vpop.f32.mrf.mxu0 }
  0xdf   :  { %v399_v44 = vadd.f32 %v2483_v22, %v398_v43  ;;  %v573_v54 = vmax.f32 %v477_v47, 0.0 }
  0xe1   :  { %v542_v46 = vmax.f32 %v399_v44, 0.0 }
  0xe3   :  { %v600_v48 = vpack.c.bf16 %v542_v46, %v541_v45 }
  0xe4   :  { %v478_v49 = vpop.f32.mrf.mxu2 }
  0xe5   :  { %v479_v50 = vadd.f32 %v2483_v22, %v478_v49  ;;  %2047 = vmatmul.msk.bf16.gmra.mxu1 %vm639_vm1, %v600_v48 }
  0xe6   :  { %v401_v53 = vpop.f32.mrf.mxu0 }
  0xe7   :  { %v574_v55 = vmax.f32 %v479_v50, 0.0  ;;  %v402_v58 = vadd.f32 %v2483_v22, %v401_v53 }
  0xe9   :  { %v616_v56 = vpack.c.bf16 %v574_v55, %v573_v54  ;;  %2020 = vmatmul.msk.bf16.gmra.mxu0 %vm265_vm0, %v2088_v51  ;;  %2036 = vmatmul.msk.bf16.gmra.mxu2 %vm265_vm0, %v2104_v52  ;;  %v543_v61 = vmax.f32 %v402_v58, 0.0 }
  0xeb   :  { %2063 = vmatmul.msk.bf16.gmra.mxu3 %vm639_vm1, %v616_v56 }
  0xec   :  { %v481_v57 = vpop.f32.mrf.mxu2 }
  0xed   :  { %v482_v63 = vadd.f32 %v2483_v22, %v481_v57 }
  0xee   :  { %v403_v59 = vpop.f32.mrf.mxu0 }
  0xef   :  { %v404_v60 = vadd.f32 %v2483_v22, %v403_v59  ;;  %v575_v6 = vmax.f32 %v482_v63, 0.0 }
  0xf1   :  { %v544_v62 = vmax.f32 %v404_v60, 0.0 }
  0xf3   :  { %v601_v0 = vpack.c.bf16 %v544_v62, %v543_v61 }
  0xf4   :  { %v483_v1 = vpop.f32.mrf.mxu2 }
  0xf5   :  { %v484_v2 = vadd.f32 %v2483_v22, %v483_v1  ;;  %2048 = vmatmul.msk.bf16.gmra.mxu1 %vm639_vm1, %v601_v0 }
  0xf6   :  { %v406_v5 = vpop.f32.mrf.mxu0 }
  0xf7   :  { %v576_v7 = vmax.f32 %v484_v2, 0.0  ;;  %v407_v10 = vadd.f32 %v2483_v22, %v406_v5 }
  0xf9   :  { %v617_v8 = vpack.c.bf16 %v576_v7, %v575_v6  ;;  %2021 = vmatmul.msk.bf16.gmra.mxu0 %vm265_vm0, %v2089_v3  ;;  %2037 = vmatmul.msk.bf16.gmra.mxu2 %vm265_vm0, %v2105_v4  ;;  %v545_v13 = vmax.f32 %v407_v10, 0.0 }
  0xfb   :  { %2064 = vmatmul.msk.bf16.gmra.mxu3 %vm639_vm1, %v617_v8 }
  0xfc   :  { %v486_v9 = vpop.f32.mrf.mxu2 }
  0xfd   :  { %v487_v15 = vadd.f32 %v2483_v22, %v486_v9 }
  0xfe   :  { %v408_v11 = vpop.f32.mrf.mxu0 }
  0xff   :  { %v409_v12 = vadd.f32 %v2483_v22, %v408_v11  ;;  %v577_v20 = vmax.f32 %v487_v15, 0.0 }
 0x101   :  { %v546_v14 = vmax.f32 %v409_v12, 0.0 }
 0x103   :  { %v602_v16 = vpack.c.bf16 %v546_v14, %v545_v13 }
 0x104   :  { %v488_v17 = vpop.f32.mrf.mxu2 }
 0x105   :  { %v489_v18 = vadd.f32 %v2483_v22, %v488_v17  ;;  %2049 = vmatmul.msk.bf16.gmra.mxu1 %vm639_vm1, %v602_v16 }
 0x106   :  { %v411_v19 = vpop.f32.mrf.mxu0 }
 0x107   :  { %v578_v21 = vmax.f32 %v489_v18, 0.0  ;;  %v412_v25 = vadd.f32 %v2483_v22, %v411_v19 }
 0x109   :  { %v618_v23 = vpack.c.bf16 %v578_v21, %v577_v20  ;;  %v547_v29 = vmax.f32 %v412_v25, 0.0 }
 0x10b   :  { %2065 = vmatmul.msk.bf16.gmra.mxu3 %vm639_vm1, %v618_v23 }
 0x10c   :  { %v491_v24 = vpop.f32.mrf.mxu2 }
 0x10d   :  { %v492_v32 = vadd.f32 %v2483_v22, %v491_v24 }
 0x10e   :  { %v413_v26 = vpop.f32.mrf.mxu0 }
 0x10f   :  { %v414_v27 = vadd.f32 %v2483_v22, %v413_v26  ;;  %v579_v40 = vmax.f32 %v492_v32, 0.0 }
 0x111   :  { %v548_v30 = vmax.f32 %v414_v27, 0.0 }
 0x112   :  { %v745_v31 = vpop.f32.mrf.mxu1 }
 0x113   :  { %v603_v33 = vpack.c.bf16 %v548_v30, %v547_v29  ;;  %v2601_v34 = vadd.f32 %v2597_v28, %v745_v31 }
 0x114   :  { %v493_v35 = vpop.f32.mrf.mxu2 }
 0x115   :  { %v494_v36 = vadd.f32 %v2483_v22, %v493_v35  ;;  %2050 = vmatmul.msk.bf16.gmra.mxu1 %vm639_vm1, %v603_v33  ;;  %v906_v37 = vsel %vm905_vm2, %v2601_v34, -inf }
 0x116   :  { %v416_v39 = vpop.f32.mrf.mxu0  ;;  %907 = vmax.xlane.f32.xlu0 %v906_v37 }
 0x117   :  { %v580_v41 = vmax.f32 %v494_v36, 0.0  ;;  %v417_v46 = vadd.f32 %v2483_v22, %v416_v39 }
 0x119   :  { %v619_v42 = vpack.c.bf16 %v580_v41, %v579_v40  ;;  %v549_v50 = vmax.f32 %v417_v46, 0.0 }
 0x11a   :  { %v747_v43 = vpop.f32.mrf.mxu1 }
 0x11b   :  { %v2608_v44 = vadd.f32 %v2597_v28, %v747_v43  ;;  %2066 = vmatmul.msk.bf16.gmra.mxu3 %vm639_vm1, %v619_v42 }
 0x11c   :  { %v496_v45 = vpop.f32.mrf.mxu2 }
 0x11d   :  { %v909_v47 = vsel %vm905_vm2, %v2608_v44, -inf  ;;  %v497_v53 = vadd.f32 %v2483_v22, %v496_v45 }
 0x11e   :  { %v418_v48 = vpop.f32.mrf.mxu0  ;;  %910 = vmax.xlane.f32.xlu0 %v909_v47 }
 0x11f   :  { %v419_v49 = vadd.f32 %v2483_v22, %v418_v48  ;;  %v581_v60 = vmax.f32 %v497_v53, 0.0 }
 0x121   :  { %v550_v51 = vmax.f32 %v419_v49, 0.0 }
 0x122   :  { %v750_v52 = vpop.f32.mrf.mxu1 }
 0x123   :  { %v604_v54 = vpack.c.bf16 %v550_v51, %v549_v50  ;;  %v2617_v55 = vadd.f32 %v2597_v28, %v750_v52 }
 0x124   :  { %v498_v56 = vpop.f32.mrf.mxu2 }
 0x125   :  { %v499_v57 = vadd.f32 %v2483_v22, %v498_v56  ;;  %2051 = vmatmul.msk.bf16.gmra.mxu1 %vm639_vm1, %v604_v54  ;;  %v912_v58 = vsel %vm905_vm2, %v2617_v55, -inf }
 0x126   :  { %v421_v59 = vpop.f32.mrf.mxu0  ;;  %913 = vmax.xlane.f32.xlu1 %v912_v58 }
 0x127   :  { %v582_v61 = vmax.f32 %v499_v57, 0.0  ;;  %v422_v0 = vadd.f32 %v2483_v22, %v421_v59 }
 0x129   :  { %v620_v62 = vpack.c.bf16 %v582_v61, %v581_v60  ;;  %v551_v6 = vmax.f32 %v422_v0, 0.0 }
 0x12a   :  { %v752_v63 = vpop.f32.mrf.mxu1 }
 0x12b   :  { %v2625_v1 = vadd.f32 %v2597_v28, %v752_v63  ;;  %2067 = vmatmul.msk.bf16.gmra.mxu3 %vm639_vm1, %v620_v62 }
 0x12c   :  { %v501_v2 = vpop.f32.mrf.mxu2 }
 0x12d   :  { %v915_v3 = vsel %vm905_vm2, %v2625_v1, -inf  ;;  %v502_v8 = vadd.f32 %v2483_v22, %v501_v2 }
 0x12e   :  { %v423_v4 = vpop.f32.mrf.mxu0  ;;  %v830_v5 = vpop.f32.mrf.mxu3  ;;  %916 = vmax.xlane.f32.xlu1 %v915_v3 }
 0x12f   :  { %v424_v7 = vadd.f32 %v2483_v22, %v423_v4  ;;  %v2633_v10 = vadd.f32 %v2597_v28, %v830_v5  ;;  %v583_v15 = vmax.f32 %v502_v8, 0.0 }
 0x131   :  { %v552_v9 = vmax.f32 %v424_v7, 0.0  ;;  %v1008_v18 = vsel %vm905_vm2, %v2633_v10, -inf }
 0x132   :  { %v755_v11 = vpop.f32.mrf.mxu1 }
 0x133   :  { %v605_v12 = vpack.c.bf16 %v552_v9, %v551_v6  ;;  %v2636_v13 = vadd.f32 %v2597_v28, %v755_v11 }
 0x134   :  { %v503_v14 = vpop.f32.mrf.mxu2 }
 0x135   :  { %v504_v16 = vadd.f32 %v2483_v22, %v503_v14  ;;  %2052 = vmatmul.msk.bf16.gmra.mxu1 %vm639_vm1, %v605_v12  ;;  %v918_v17 = vsel %vm905_vm2, %v2636_v13, -inf }
 0x136   :  { %v426_v19 = vpop.f32.mrf.mxu0  ;;  %v832_v20 = vpop.f32.mrf.mxu3  ;;  %919 = vmax.xlane.f32.xlu2 %v918_v17  ;;  %1009 = vmax.xlane.f32.xlu1 %v1008_v18 }
 0x137   :  { %v584_v21 = vmax.f32 %v504_v16, 0.0  ;;  %v2645_v24 = vadd.f32 %v2597_v28, %v832_v20  ;;  %v427_v26 = vadd.f32 %v2483_v22, %v426_v19 }
 0x139   :  { %v621_v23 = vpack.c.bf16 %v584_v21, %v583_v15  ;;  %v1011_v29 = vsel %vm905_vm2, %v2645_v24, -inf  ;;  %v553_v32 = vmax.f32 %v427_v26, 0.0 }
 0x13a   :  { %v757_v25 = vpop.f32.mrf.mxu1 }
 0x13b   :  { %2068 = vmatmul.msk.bf16.gmra.mxu3 %vm639_vm1, %v621_v23  ;;  %v2656_v36 = vadd.f32 %v2597_v28, %v757_v25 }
 0x13c   :  { %v506_v27 = vpop.f32.mrf.mxu2 }
 0x13d   :  { %v507_v37 = vadd.f32 %v2483_v22, %v506_v27  ;;  %v921_v48 = vsel %vm905_vm2, %v2656_v36, -inf }
 0x13e   :  { %v428_v30 = vpop.f32.mrf.mxu0  ;;  %v835_v31 = vpop.f32.mrf.mxu3  ;;  %1012 = vmax.xlane.f32.xlu2 %v1011_v29 }
 0x13f   :  { %v429_v33 = vadd.f32 %v2483_v22, %v428_v30  ;;  %v2653_v35 = vadd.f32 %v2597_v28, %v835_v31  ;;  %v585_v45 = vmax.f32 %v507_v37, 0.0 }
 0x141   :  { %v554_v39 = vmax.f32 %v429_v33, 0.0  ;;  %v1014_v40 = vsel %vm905_vm2, %v2653_v35, -inf }
 0x142   :  { %v760_v41 = vpop.f32.mrf.mxu1  ;;  %1015 = vmax.xlane.f32.xlu0 %v1014_v40 }
 0x143   :  { %v606_v42 = vpack.c.bf16 %v554_v39, %v553_v32  ;;  %v2662_v46 = vadd.f32 %v2597_v28, %v760_v41 }
 0x144   :  { %v508_v43 = vpop.f32.mrf.mxu2 }
 0x145   :  { %v509_v47 = vadd.f32 %v2483_v22, %v508_v43  ;;  %2053 = vmatmul.msk.bf16.gmra.mxu1 %vm639_vm1, %v606_v42  ;;  %v924_v56 = vsel %vm905_vm2, %v2662_v46, -inf }
 0x146   :  { %v431_v49 = vpop.f32.mrf.mxu0  ;;  %v837_v50 = vpop.f32.mrf.mxu3  ;;  %922 = vmax.xlane.f32.xlu2 %v921_v48 }
 0x147   :  { %v586_v51 = vmax.f32 %v509_v47, 0.0  ;;  %v2669_v52 = vadd.f32 %v2597_v28, %v837_v50  ;;  %v432_v58 = vadd.f32 %v2483_v22, %v431_v49 }
 0x149   :  { %v622_v53 = vpack.c.bf16 %v586_v51, %v585_v45  ;;  %v1017_v54 = vsel %vm905_vm2, %v2669_v52, -inf  ;;  %v555_v63 = vmax.f32 %v432_v58, 0.0 }
 0x14a   :  { %v762_v57 = vpop.f32.mrf.mxu1  ;;  %1018 = vmax.xlane.f32.xlu1 %v1017_v54  ;;  %925 = vmax.xlane.f32.xlu0 %v924_v56 }
 0x14b   :  { %2069 = vmatmul.msk.bf16.gmra.mxu3 %vm639_vm1, %v622_v53  ;;  %v2678_v60 = vadd.f32 %v2597_v28, %v762_v57 }
 0x14c   :  { %v511_v59 = vpop.f32.mrf.mxu2 }
 0x14d   :  { %v512_v3 = vadd.f32 %v2483_v22, %v511_v59  ;;  %v927_v6 = vsel %vm905_vm2, %v2678_v60, -inf }
 0x14e   :  { %v433_v61 = vpop.f32.mrf.mxu0  ;;  %v840_v62 = vpop.f32.mrf.mxu3 }
 0x14f   :  { %v434_v0 = vadd.f32 %v2483_v22, %v433_v61  ;;  %v2682_v2 = vadd.f32 %v2597_v28, %v840_v62  ;;  %v587_v11 = vmax.f32 %v512_v3, 0.0 }
 0x151   :  { %v556_v4 = vmax.f32 %v434_v0, 0.0  ;;  %v1020_v5 = vsel %vm905_vm2, %v2682_v2, -inf }
 0x152   :  { %v765_v7 = vpop.f32.mrf.mxu1  ;;  %1021 = vmax.xlane.f32.xlu2 %v1020_v5  ;;  %928 = vmax.xlane.f32.xlu1 %v927_v6 }
 0x153   :  { %v607_v8 = vpack.c.bf16 %v556_v4, %v555_v63  ;;  %v2690_v12 = vadd.f32 %v2597_v28, %v765_v7 }
 0x154   :  { %v513_v9 = vpop.f32.mrf.mxu2 }
 0x155   :  { %v514_v14 = vadd.f32 %v2483_v22, %v513_v9  ;;  %2054 = vmatmul.msk.bf16.gmra.mxu1 %vm639_vm1, %v607_v8  ;;  %v930_v20 = vsel %vm905_vm2, %v2690_v12, -inf }
 0x156   :  { %v436_v15 = vpop.f32.mrf.mxu0  ;;  %v842_v16 = vpop.f32.mrf.mxu3 }
 0x157   :  { %v588_v17 = vmax.f32 %v514_v14, 0.0  ;;  %v2695_v18 = vadd.f32 %v2597_v28, %v842_v16  ;;  %v437_v25 = vadd.f32 %v2483_v22, %v436_v15 }
 0x159   :  { %v623_v19 = vpack.c.bf16 %v588_v17, %v587_v11  ;;  %v1023_v21 = vsel %vm905_vm2, %v2695_v18, -inf  ;;  %v557_v31 = vmax.f32 %v437_v25, 0.0 }
 0x15a   :  { %v767_v23 = vpop.f32.mrf.mxu1  ;;  %931 = vmax.xlane.f32.xlu2 %v930_v20  ;;  %1024 = vmax.xlane.f32.xlu0 %v1023_v21 }
 0x15b   :  { %2070 = vmatmul.msk.bf16.gmra.mxu3 %vm639_vm1, %v623_v19  ;;  %v2704_v27 = vadd.f32 %v2597_v28, %v767_v23 }
 0x15c   :  { %v516_v26 = vpop.f32.mrf.mxu2 }
 0x15d   :  { %v933_v40 = vsel %vm905_vm2, %v2704_v27, -inf  ;;  %v517_v41 = vadd.f32 %v2483_v22, %v516_v26 }
 0x15e   :  { %v438_v29 = vpop.f32.mrf.mxu0  ;;  %v845_v30 = vpop.f32.mrf.mxu3 }
 0x15f   :  { %v439_v32 = vadd.f32 %v2483_v22, %v438_v29  ;;  %v2708_v33 = vadd.f32 %v2597_v28, %v845_v30  ;;  %v589_v48 = vmax.f32 %v517_v41, 0.0 }
 0x161   :  { %v558_v37 = vmax.f32 %v439_v32, 0.0  ;;  %v1026_v39 = vsel %vm905_vm2, %v2708_v33, -inf }
 0x162   :  { %v770_v42 = vpop.f32.mrf.mxu1  ;;  %1027 = vmax.xlane.f32.xlu1 %v1026_v39  ;;  %934 = vmax.xlane.f32.xlu0 %v933_v40 }
 0x163   :  { %v608_v43 = vpack.c.bf16 %v558_v37, %v557_v31  ;;  %v2716_v47 = vadd.f32 %v2597_v28, %v770_v42 }
 0x164   :  { %v518_v45 = vpop.f32.mrf.mxu2 }
 0x165   :  { %2055 = vmatmul.msk.bf16.gmra.mxu1 %vm639_vm1, %v608_v43  ;;  %v519_v49 = vadd.f32 %v2483_v22, %v518_v45  ;;  %v936_v57 = vsel %vm905_vm2, %v2716_v47, -inf }
 0x166   :  { %v441_v50 = vpop.f32.mrf.mxu0  ;;  %v847_v51 = vpop.f32.mrf.mxu3 }
 0x167   :  { %v2721_v53 = vadd.f32 %v2597_v28, %v847_v51  ;;  %v590_v54 = vmax.f32 %v519_v49, 0.0  ;;  %v442_v61 = vadd.f32 %v2483_v22, %v441_v50 }
 0x169   :  { %v1029_v56 = vsel %vm905_vm2, %v2721_v53, -inf  ;;  %v624_v58 = vpack.c.bf16 %v590_v54, %v589_v48  ;;  %v559_v4 = vmax.f32 %v442_v61, 0.0 }
 0x16a   :  { %v772_v59 = vpop.f32.mrf.mxu1  ;;  %1030 = vmax.xlane.f32.xlu2 %v1029_v56  ;;  %937 = vmax.xlane.f32.xlu1 %v936_v57 }
 0x16b   :  { %2071 = vmatmul.msk.bf16.gmra.mxu3 %vm639_vm1, %v624_v58  ;;  %v2730_v63 = vadd.f32 %v2597_v28, %v772_v59 }
 0x16c   :  { %v521_v62 = vpop.f32.mrf.mxu2 }
 0x16d   :  { %v939_v8 = vsel %vm905_vm2, %v2730_v63, -inf  ;;  %v522_v11 = vadd.f32 %v2483_v22, %v521_v62 }
 0x16e   :  { %v443_v0 = vpop.f32.mrf.mxu0  ;;  %v850_v3 = vpop.f32.mrf.mxu3 }
 0x16f   :  { %v444_v5 = vadd.f32 %v2483_v22, %v443_v0  ;;  %v2734_v6 = vadd.f32 %v2597_v28, %v850_v3  ;;  %v591_v19 = vmax.f32 %v522_v11, 0.0 }
 0x171   :  { %v560_v7 = vmax.f32 %v444_v5, 0.0  ;;  %v1032_v9 = vsel %vm905_vm2, %v2734_v6, -inf }
 0x172   :  { %v775_v14 = vpop.f32.mrf.mxu1  ;;  %940 = vmax.xlane.f32.xlu2 %v939_v8  ;;  %1033 = vmax.xlane.f32.xlu0 %v1032_v9 }
 0x173   :  { %v609_v15 = vpack.c.bf16 %v560_v7, %v559_v4  ;;  %v2742_v17 = vadd.f32 %v2597_v28, %v775_v14 }
 0x174   :  { %v523_v16 = vpop.f32.mrf.mxu2 }
 0x175   :  { %2056 = vmatmul.msk.bf16.gmra.mxu1 %vm639_vm1, %v609_v15  ;;  %v524_v20 = vadd.f32 %v2483_v22, %v523_v16  ;;  %v942_v30 = vsel %vm905_vm2, %v2742_v17, -inf }
 0x176   :  { %v446_v21 = vpop.f32.mrf.mxu0  ;;  %v852_v23 = vpop.f32.mrf.mxu3 }
 0x177   :  { %v2747_v25 = vadd.f32 %v2597_v28, %v852_v23  ;;  %v592_v26 = vmax.f32 %v524_v20, 0.0  ;;  %v447_v37 = vadd.f32 %v2483_v22, %v446_v21 }
 0x179   :  { %v1035_v29 = vsel %vm905_vm2, %v2747_v25, -inf  ;;  %v625_v31 = vpack.c.bf16 %v592_v26, %v591_v19  ;;  %v561_v43 = vmax.f32 %v447_v37, 0.0 }
 0x17a   :  { %v777_v32 = vpop.f32.mrf.mxu1  ;;  %1036 = vmax.xlane.f32.xlu1 %v1035_v29  ;;  %943 = vmax.xlane.f32.xlu0 %v942_v30 }
 0x17b   :  { %2072 = vmatmul.msk.bf16.gmra.mxu3 %vm639_vm1, %v625_v31  ;;  %v2756_v40 = vadd.f32 %v2597_v28, %v777_v32 }
 0x17c   :  { %v526_v39 = vpop.f32.mrf.mxu2 }
 0x17d   :  { %v945_v51 = vsel %vm905_vm2, %v2756_v40, -inf  ;;  %v527_v54 = vadd.f32 %v2483_v22, %v526_v39 }
 0x17e   :  { %v448_v41 = vpop.f32.mrf.mxu0  ;;  %v855_v42 = vpop.f32.mrf.mxu3 }
 0x17f   :  { %v449_v45 = vadd.f32 %v2483_v22, %v448_v41  ;;  %v2760_v48 = vadd.f32 %v2597_v28, %v855_v42  ;;  %v593_v61 = vmax.f32 %v527_v54, 0.0 }
 0x181   :  { %v562_v49 = vmax.f32 %v449_v45, 0.0  ;;  %v1038_v50 = vsel %vm905_vm2, %v2760_v48, -inf }
 0x182   :  { %v780_v56 = vpop.f32.mrf.mxu1  ;;  %1039 = vmax.xlane.f32.xlu2 %v1038_v50  ;;  %946 = vmax.xlane.f32.xlu1 %v945_v51 }
 0x183   :  { %v610_v57 = vpack.c.bf16 %v562_v49, %v561_v43  ;;  %v2768_v59 = vadd.f32 %v2597_v28, %v780_v56 }
 0x184   :  { %v528_v58 = vpop.f32.mrf.mxu2 }
 0x185   :  { %2057 = vmatmul.msk.bf16.gmra.mxu1 %vm639_vm1, %v610_v57  ;;  %v529_v62 = vadd.f32 %v2483_v22, %v528_v58  ;;  %v948_v5 = vsel %vm905_vm2, %v2768_v59, -inf }
 0x186   :  { %v857_v0 = vpop.f32.mrf.mxu3 }
 0x187   :  { %v2773_v3 = vadd.f32 %v2597_v28, %v857_v0  ;;  %v594_v4 = vmax.f32 %v529_v62, 0.0 }
 0x189   :  { %v1041_v7 = vsel %vm905_vm2, %v2773_v3, -inf  ;;  %v626_v8 = vpack.c.bf16 %v594_v4, %v593_v61  ;;  %v908_v11 = vpop.xlane.xlu0 %907 }
 0x18a   :  { %v782_v9 = vpop.f32.mrf.mxu1  ;;  %949 = vmax.xlane.f32.xlu2 %v948_v5  ;;  %1042 = vmax.xlane.f32.xlu0 %v1041_v7  ;;  %v1098_v16 = vsub.f32 %v2601_v34, %v908_v11 }
 0x18b   :  { %2073 = vmatmul.msk.bf16.gmra.mxu3 %vm639_vm1, %v626_v8  ;;  %v2781_v22 = vadd.f32 %v2597_v28, %v782_v9 }
 0x18c   :  { %v1162_v23 = vmul.f32 1.442695, %v1098_v16 }
 0x18d   :  { %v951_v20 = vsel %vm905_vm2, %v2781_v22, -inf }
 0x18e   :  { %v860_v14 = vpop.f32.mrf.mxu3  ;;  %2114 = vpow2.f32 %v1162_v23 }
 0x18f   :  { %v2784_v15 = vadd.f32 %v2597_v28, %v860_v14 }
 0x191   :  { %v1044_v19 = vsel %vm905_vm2, %v2784_v15, -inf  ;;  %v911_v26 = vpop.xlane.xlu0 %910 }
 0x192   :  { %v785_v21 = vpop.f32.mrf.mxu1  ;;  %1045 = vmax.xlane.f32.xlu1 %v1044_v19  ;;  %952 = vmax.xlane.f32.xlu0 %v951_v20  ;;  %v1099_v31 = vsub.f32 %v2608_v44, %v911_v26 }
 0x193   :  { %v2792_v29 = vadd.f32 %v2597_v28, %v785_v21 }
 0x194   :  { %v1164_v42 = vmul.f32 1.442695, %v1099_v31  ;;  %v2807_v45 = vpop.eup %2114 }
 0x195   :  { %2058 = vmatmul.msk.bf16.gmra.mxu1 %vm639_vm1, %v2498_v38  ;;  %v954_v39 = vsel %vm905_vm2, %v2792_v29, -inf  ;;  %v1290_v57 = vsel %vm905_vm2, %v2807_v45, 0.0 }
 0x196   :  { %v862_v30 = vpop.f32.mrf.mxu3  ;;  %2116 = vpow2.f32 %v1164_v42 }
 0x197   :  { %v2797_v34 = vadd.f32 %v2597_v28, %v862_v30 }
 0x199   :  { %v914_v32 = vpop.xlane.xlu1 %913  ;;  %v1047_v37 = vsel %vm905_vm2, %v2797_v34, -inf }
 0x19a   :  { %v787_v41 = vpop.f32.mrf.mxu1  ;;  %1048 = vmax.xlane.f32.xlu2 %v1047_v37  ;;  %955 = vmax.xlane.f32.xlu1 %v954_v39  ;;  %v1100_v49 = vsub.f32 %v2617_v55, %v914_v32 }
 0x19b   :  { %v2805_v38 = vadd.f32 %v2597_v28, %v787_v41 }
 0x19c   :  { %v1166_v58 = vmul.f32 1.442695, %v1100_v49  ;;  %v2822_v62 = vpop.eup %2116 }
 0x19d   :  { %v957_v51 = vsel %vm905_vm2, %v2805_v38, -inf  ;;  %v1293_v11 = vsel %vm905_vm2, %v2822_v62, 0.0 }
 0x19e   :  { %v865_v43 = vpop.f32.mrf.mxu3  ;;  %2118 = vpow2.f32 %v1166_v58 }
 0x19f   :  { %v2810_v44 = vadd.f32 %v2597_v28, %v865_v43 }
 0x1a1   :  { %v917_v50 = vpop.xlane.xlu1 %916  ;;  %v1050_v54 = vsel %vm905_vm2, %v2810_v44, -inf }
 0x1a2   :  { %v790_v56 = vpop.f32.mrf.mxu1  ;;  %958 = vmax.xlane.f32.xlu2 %v957_v51  ;;  %1051 = vmax.xlane.f32.xlu0 %v1050_v54  ;;  %v1101_v4 = vsub.f32 %v2625_v1, %v917_v50 }
 0x1a3   :  { %1291 = vadd.xlane.f32.xlu1 %v1290_v57  ;;  %v2820_v61 = vadd.f32 %v2597_v28, %v790_v56 }
 0x1a4   :  { %v1168_v20 = vmul.f32 1.442695, %v1101_v4  ;;  %v2835_v1 = vpop.eup %2118 }
 0x1a5   :  { %v960_v8 = vsel %vm905_vm2, %v2820_v61, -inf }
 0x1a6   :  { %v867_v55 = vpop.f32.mrf.mxu3 }
 0x1a7   :  { %v2825_v0 = vadd.f32 %v2597_v28, %v867_v55 }
 0x1a9   :  { %v920_v5 = vpop.xlane.xlu2 %919  ;;  %v1010_v7 = vpop.xlane.xlu1 %1009  ;;  %v1053_v9 = vsel %vm905_vm2, %v2825_v0, -inf }
 0x1aa   :  { %v1132_v14 = vsub.f32 %v2633_v10, %v1010_v7  ;;  %961 = vmax.xlane.f32.xlu0 %v960_v8  ;;  %1294 = vadd.xlane.f32.xlu2 %v1293_v11  ;;  %v792_v16 = vpop.f32.mrf.mxu1  ;;  %v1296_v10 = vsel %vm905_vm2, %v2835_v1, 0.0  ;;  %v1102_v54 = vsub.f32 %v2636_v13, %v920_v5 }
 0x1ab   :  { %1054 = vmax.xlane.f32.xlu1 %v1053_v9  ;;  %v2838_v21 = vadd.f32 %v2597_v28, %v792_v16 }
 0x1ac   :  { %v1230_v19 = vmul.f32 1.442695, %v1132_v14  ;;  %v1170_v55 = vmul.f32 1.442695, %v1102_v54 }
 0x1ad   :  { %v963_v37 = vsel %vm905_vm2, %v2838_v21, -inf }
 0x1ae   :  { %v870_v23 = vpop.f32.mrf.mxu3  ;;  %2120 = vpow2.f32 %v1230_v19 }
 0x1af   :  { %v2841_v26 = vadd.f32 %v2597_v28, %v870_v23  ;;  %2122 = vpow2.f32 %v1168_v20 }
 0x1b1   :  { %v1013_v30 = vpop.xlane.xlu2 %1012  ;;  %v1056_v31 = vsel %vm905_vm2, %v2841_v26, -inf }
 0x1b2   :  { %v1133_v32 = vsub.f32 %v2645_v24, %v1013_v30  ;;  %1297 = vadd.xlane.f32.xlu0 %v1296_v10  ;;  %1057 = vmax.xlane.f32.xlu2 %v1056_v31  ;;  %v795_v50 = vpop.f32.mrf.mxu1 }
 0x1b3   :  { %964 = vmax.xlane.f32.xlu1 %v963_v37  ;;  %v2866_v4 = vadd.f32 %v2597_v28, %v795_v50 }
 0x1b4   :  { %v1232_v39 = vmul.f32 1.442695, %v1133_v32  ;;  %v2850_v41 = vpop.eup %2120 }
 0x1b5   :  { %v1016_v42 = vpop.xlane.xlu0 %1015  ;;  %v2852_v49 = vpop.eup %2122  ;;  %v1392_v57 = vsel %vm905_vm2, %v2850_v41, 0.0  ;;  %v966_v19 = vsel %vm905_vm2, %v2866_v4, -inf }
 0x1b6   :  { %v872_v43 = vpop.f32.mrf.mxu3  ;;  %2124 = vpow2.f32 %v1232_v39  ;;  %v1134_v24 = vsub.f32 %v2653_v35, %v1016_v42  ;;  %v1299_v58 = vsel %vm905_vm2, %v2852_v49, 0.0 }
 0x1b7   :  { %v2855_v51 = vadd.f32 %v2597_v28, %v872_v43  ;;  %2126 = vpow2.f32 %v1170_v55 }
 0x1b8   :  { %v1234_v13 = vmul.f32 1.442695, %v1134_v24 }
 0x1b9   :  { %v1059_v56 = vsel %vm905_vm2, %v2855_v51, -inf  ;;  %v923_v5 = vpop.xlane.xlu2 %922 }
 0x1ba   :  { %1060 = vmax.xlane.f32.xlu0 %v1059_v56  ;;  %1393 = vadd.xlane.f32.xlu2 %v1392_v57  ;;  %v1103_v9 = vsub.f32 %v2656_v36, %v923_v5  ;;  %2128 = vpow2.f32 %v1234_v13  ;;  %v797_v11 = vpop.f32.mrf.mxu1 }
 0x1bb   :  { %1300 = vadd.xlane.f32.xlu1 %v1299_v58  ;;  %v2881_v23 = vadd.f32 %v2597_v28, %v797_v11 }
 0x1bc   :  { %v2868_v7 = vpop.eup %2124  ;;  %v1172_v20 = vmul.f32 1.442695, %v1103_v9 }
 0x1bd   :  { %v1395_v14 = vsel %vm905_vm2, %v2868_v7, 0.0  ;;  %v1019_v30 = vpop.xlane.xlu1 %1018  ;;  %v2883_v36 = vpop.eup %2126  ;;  %v969_v42 = vsel %vm905_vm2, %v2881_v23, -inf }
 0x1be   :  { %v875_v35 = vpop.f32.mrf.mxu3  ;;  %v926_v10 = vpop.xlane.xlu0 %925  ;;  %2130 = vpow2.f32 %v1172_v20  ;;  %v1135_v37 = vsub.f32 %v2669_v52, %v1019_v30  ;;  %v1302_v43 = vsel %vm905_vm2, %v2883_v36, 0.0 }
 0x1bf   :  { %v2871_v8 = vadd.f32 %v2597_v28, %v875_v35  ;;  %v1104_v39 = vsub.f32 %v2662_v46, %v926_v10 }
 0x1c0   :  { %v2885_v31 = vpop.eup %2128  ;;  %v1236_v24 = vmul.f32 1.442695, %v1135_v37 }
 0x1c1   :  { %v1062_v16 = vsel %vm905_vm2, %v2871_v8, -inf  ;;  %v1398_v50 = vsel %vm905_vm2, %v2885_v31, 0.0  ;;  %v1174_v52 = vmul.f32 1.442695, %v1104_v39 }
 0x1c2   :  { %1396 = vadd.xlane.f32.xlu0 %v1395_v14  ;;  %967 = vmax.xlane.f32.xlu2 %v966_v19  ;;  %v800_v54 = vpop.f32.mrf.mxu1  ;;  %2132 = vpow2.f32 %v1236_v24 }
 0x1c3   :  { %1063 = vmax.xlane.f32.xlu1 %v1062_v16  ;;  %v2896_v56 = vadd.f32 %v2597_v28, %v800_v54  ;;  %2134 = vpow2.f32 %v1174_v52 }
 0x1c4   :  { %v2901_v58 = vpop.eup %2130 }
 0x1c5   :  { %v1022_v57 = vpop.xlane.xlu2 %1021  ;;  %v972_v13 = vsel %vm905_vm2, %v2896_v56, -inf  ;;  %v1305_v35 = vsel %vm905_vm2, %v2901_v58, 0.0  ;;  %v929_v14 = vpop.xlane.xlu1 %928 }
 0x1c6   :  { %v877_v32 = vpop.f32.mrf.mxu3  ;;  %v1136_v55 = vsub.f32 %v2682_v2, %v1022_v57  ;;  %v1105_v30 = vsub.f32 %v2678_v60, %v929_v14 }
 0x1c7   :  { %v2899_v46 = vadd.f32 %v2597_v28, %v877_v32 }
 0x1c8   :  { %v1238_v11 = vmul.f32 1.442695, %v1136_v55  ;;  %v2913_v2 = vpop.eup %2132 }
 0x1c9   :  { %v1065_v9 = vsel %vm905_vm2, %v2899_v46, -inf  ;;  %v2915_v20 = vpop.eup %2134  ;;  %v1401_v39 = vsel %vm905_vm2, %v2913_v2, 0.0 }
 0x1ca   :  { %970 = vmax.xlane.f32.xlu0 %v969_v42  ;;  %1303 = vadd.xlane.f32.xlu2 %v1302_v43  ;;  %2136 = vpow2.f32 %v1238_v11  ;;  %v802_v10 = vpop.f32.mrf.mxu1  ;;  %v1308_v42 = vsel %vm905_vm2, %v2915_v20, 0.0 }
 0x1cb   :  { %1399 = vadd.xlane.f32.xlu1 %v1398_v50  ;;  %v1176_v50 = vmul.f32 1.442695, %v1105_v30  ;;  %v2926_v54 = vadd.f32 %v2597_v28, %v802_v10 }
 0x1cd   :  { %v1025_v19 = vpop.xlane.xlu0 %1024  ;;  %v932_v60 = vpop.xlane.xlu2 %931  ;;  %2138 = vpow2.f32 %v1176_v50 }
 0x1ce   :  { %v880_v5 = vpop.f32.mrf.mxu3  ;;  %v1137_v32 = vsub.f32 %v2695_v18, %v1025_v19  ;;  %v1106_v57 = vsub.f32 %v2690_v12, %v932_v60 }
 0x1cf   :  { %v2911_v16 = vadd.f32 %v2597_v28, %v880_v5  ;;  %v975_v5 = vsel %vm905_vm2, %v2926_v54, -inf }
 0x1d0   :  { %v1240_v24 = vmul.f32 1.442695, %v1137_v32  ;;  %v2928_v18 = vpop.eup %2136  ;;  %v1178_v11 = vmul.f32 1.442695, %v1106_v57 }
 0x1d1   :  { %v1068_v37 = vsel %vm905_vm2, %v2911_v16, -inf }
 0x1d2   :  { %1306 = vadd.xlane.f32.xlu0 %v1305_v35  ;;  %1066 = vmax.xlane.f32.xlu2 %v1065_v9  ;;  %2140 = vpow2.f32 %v1240_v24  ;;  %v805_v9 = vpop.f32.mrf.mxu1 }
 0x1d3   :  { %973 = vmax.xlane.f32.xlu1 %v972_v13  ;;  %v1404_v13 = vsel %vm905_vm2, %v2928_v18, 0.0  ;;  %v2941_v14 = vadd.f32 %v2597_v28, %v805_v9  ;;  %v2943_v12 = vpop.eup %2138  ;;  %2142 = vpow2.f32 %v1178_v11 }
 0x1d5   :  { %v1028_v55 = vpop.xlane.xlu1 %1027  ;;  %v935_v19 = vpop.xlane.xlu0 %934 }
 0x1d6   :  { %v882_v43 = vpop.f32.mrf.mxu3  ;;  %v1138_v10 = vsub.f32 %v2708_v33, %v1028_v55 }
 0x1d7   :  { %v2931_v52 = vadd.f32 %v2597_v28, %v882_v43  ;;  %v1311_v43 = vsel %vm905_vm2, %v2943_v12, 0.0 }
 0x1d8   :  { %v2945_v30 = vpop.eup %2140  ;;  %v1242_v24 = vmul.f32 1.442695, %v1138_v10 }
 0x1d9   :  { %v1071_v35 = vsel %vm905_vm2, %v2931_v52, -inf  ;;  %v1407_v50 = vsel %vm905_vm2, %v2945_v30, 0.0 }
 0x1da   :  { %1069 = vmax.xlane.f32.xlu0 %v1068_v37  ;;  %1402 = vadd.xlane.f32.xlu2 %v1401_v39  ;;  %v1107_v37 = vsub.f32 %v2704_v27, %v935_v19  ;;  %v807_v33 = vpop.f32.mrf.mxu1  ;;  %v2958_v27 = vpop.eup %2142  ;;  %2144 = vpow2.f32 %v1242_v24 }
 0x1db   :  { %1309 = vadd.xlane.f32.xlu1 %v1308_v42  ;;  %v978_v42 = vsel %vm905_vm2, %v2941_v14, -inf  ;;  %3687 = vst [vmem:[#allocation2_spill] sm:$0xff] %v2958_v27  ;;  %v1314_v9 = vsel %vm905_vm2, %v2958_v27, 0.0 }
 0x1dc   :  { %v1180_v57 = vmul.f32 1.442695, %v1107_v37 }
 0x1dd   :  { %v1031_v39 = vpop.xlane.xlu2 %1030  ;;  %v938_v60 = vpop.xlane.xlu1 %937 }
 0x1de   :  { %v885_v32 = vpop.f32.mrf.mxu3  ;;  %2146 = vpow2.f32 %v1180_v57  ;;  %v1108_v24 = vsub.f32 %v2716_v47, %v938_v60 }
 0x1df   :  { %v2956_v55 = vadd.f32 %v2597_v28, %v885_v32 }
 0x1e1   :  { %v1074_v11 = vsel %vm905_vm2, %v2956_v55, -inf }
 0x1e2   :  { %1405 = vadd.xlane.f32.xlu0 %v1404_v13  ;;  %976 = vmax.xlane.f32.xlu2 %v975_v5  ;;  %v2961_v13 = vadd.f32 %v2597_v28, %v807_v33  ;;  %v1139_v5 = vsub.f32 %v2721_v53, %v1031_v39  ;;  %v2973_v39 = vpop.eup %2144 }
 0x1e3   :  { %1072 = vmax.xlane.f32.xlu1 %v1071_v35  ;;  %3688 = vst [vmem:[#allocation3_spill] sm:$0xff] %v2973_v39 }
 0x1e4   :  { %v981_v10 = vsel %vm905_vm2, %v2961_v13, -inf }
 0x1e5   :  { %v1034_v35 = vpop.xlane.xlu0 %1033  ;;  %v941_v32 = vpop.xlane.xlu2 %940 }
 0x1e6   :  { %v887_v19 = vpop.f32.mrf.mxu3  ;;  %v1140_v57 = vsub.f32 %v2734_v6, %v1034_v35 }
 0x1e7   :  { %v2971_v53 = vadd.f32 %v2597_v28, %v887_v19 }
 0x1e8   :  { %v1246_v60 = vmul.f32 1.442695, %v1140_v57 }
 0x1e9   :  { %v1077_v33 = vsel %vm905_vm2, %v2971_v53, -inf }
 0x1ea   :  { %979 = vmax.xlane.f32.xlu0 %v978_v42  ;;  %1312 = vadd.xlane.f32.xlu2 %v1311_v43  ;;  %v1244_v42 = vmul.f32 1.442695, %v1139_v5  ;;  %v2975_v43 = vpop.eup %2146 }
 0x1eb   :  { %1408 = vadd.xlane.f32.xlu1 %v1407_v50  ;;  %3689 = vst [vmem:[#allocation4_spill] sm:$0xff] %v2975_v43  ;;  %v810_v50 = vpop.f32.mrf.mxu1 }
 0x1ec   :  { %2148 = vpow2.f32 %v1244_v42  ;;  %v1182_v42 = vmul.f32 1.442695, %v1108_v24  ;;  %v2989_v6 = vadd.f32 %v2597_v28, %v810_v50 }
 0x1ed   :  { %v1037_v37 = vpop.xlane.xlu1 %1036  ;;  %v944_v5 = vpop.xlane.xlu0 %943 }
 0x1ee   :  { %3691 = vst [vmem:[#allocation6_spill] sm:$0xff] %v2989_v6  ;;  %2150 = vpow2.f32 %v1182_v42  ;;  %v984_v50 = vsel %vm905_vm2, %v2989_v6, -inf }
 0x1ef   :  { %2152 = vpow2.f32 %v1246_v60 }
 0x1f2   :  { %1315 = vadd.xlane.f32.xlu0 %v1314_v9  ;;  %1075 = vmax.xlane.f32.xlu2 %v1074_v11  ;;  %v1410_v9 = vsel %vm905_vm2, %v2973_v39, 0.0  ;;  %v1317_v11 = vsel %vm905_vm2, %v2975_v43, 0.0  ;;  %v2993_v39 = vpop.eup %2148 }
 0x1f3   :  { %982 = vmax.xlane.f32.xlu1 %v981_v10  ;;  %v890_v10 = vpop.f32.mrf.mxu3  ;;  %3692 = vst [vmem:[#allocation7_spill] sm:$0xff] %v2993_v39  ;;  %v1413_v24 = vsel %vm905_vm2, %v2993_v39, 0.0 }
 0x1f4   :  { %v2986_v47 = vadd.f32 %v2597_v28, %v890_v10  ;;  %v3009_v60 = vpop.eup %2150 }
 0x1f5   :  { %v1040_v19 = vpop.xlane.xlu2 %1039  ;;  %v2991_v35 = vpop.xlane.xlu1 %946  ;;  %3694 = vst [vmem:[#allocation9_spill] sm:$0xff] %v3009_v60 }
 0x1f6   :  { %3690 = vst [vmem:[#allocation5_spill] sm:$0xff] %v2986_v47  ;;  %v3011_v43 = vpop.eup %2152 }
 0x1f7   :  { %3695 = vst [vmem:[#allocation10_spill] sm:$0xff] %v3011_v43 }
 0x1fa   :  { %1078 = vmax.xlane.f32.xlu0 %v1077_v33  ;;  %1411 = vadd.xlane.f32.xlu2 %v1410_v9  ;;  %v1109_v33 = vsub.f32 %v2730_v63, %v941_v32  ;;  %v1080_v9 = vsel %vm905_vm2, %v2986_v47, -inf  ;;  %v1141_v47 = vsub.f32 %v2747_v25, %v1037_v37 }
 0x1fb   :  { %1318 = vadd.xlane.f32.xlu1 %v1317_v11  ;;  %v812_v11 = vpop.f32.mrf.mxu1  ;;  %v892_v39 = vpop.f32.mrf.mxu3 }
 0x1fc   :  { %v1184_v57 = vmul.f32 1.442695, %v1109_v33  ;;  %v3003_v42 = vadd.f32 %v2597_v28, %v812_v11  ;;  %v1416_v11 = vsel %vm905_vm2, %v3011_v43, 0.0  ;;  %v1248_v6 = vmul.f32 1.442695, %v1141_v47 }
 0x1fd   :  { %v1043_v10 = vpop.xlane.xlu0 %1042  ;;  %v3005_v63 = vpop.xlane.xlu2 %949  ;;  %v3027_v37 = vadd.f32 %v2597_v28, %v892_v39 }
 0x1fe   :  { %3693 = vst [vmem:[#allocation8_spill] sm:$0xff] %v3003_v42  ;;  %2154 = vpow2.f32 %v1184_v57  ;;  %v987_v33 = vsel %vm905_vm2, %v3003_v42, -inf }
 0x1ff   :  { %3697 = vst [vmem:[#allocation12_spill] sm:$0xff] %v3027_v37  ;;  %2156 = vpow2.f32 %v1248_v6  ;;  %v3045_v6 = vld [vmem:[%s3667_s4] ss:$0 sm:$0xff] }
 0x202   :  { %1414 = vadd.xlane.f32.xlu0 %v1413_v24  ;;  %985 = vmax.xlane.f32.xlu2 %v984_v50  ;;  %v1110_v24 = vsub.f32 %v2742_v17, %v944_v5 }
 0x203   :  { %1081 = vmax.xlane.f32.xlu1 %v1080_v9  ;;  %v1320_v9 = vsel %vm905_vm2, %v3009_v60, 0.0  ;;  %v815_v50 = vpop.f32.mrf.mxu1 }
 0x204   :  { %v3022_v57 = vadd.f32 %v2597_v28, %v815_v50  ;;  %v1186_v17 = vmul.f32 1.442695, %v1110_v24  ;;  %v1083_v28 = vsel %vm905_vm2, %v3027_v37, -inf }
 0x205   :  { %v3007_v32 = vpop.xlane.xlu1 %1045  ;;  %v3024_v25 = vpop.xlane.xlu0 %952 }
 0x206   :  { %3696 = vst [vmem:[#allocation11_spill] sm:$0xff] %v3022_v57  ;;  %v990_v47 = vsel %vm905_vm2, %v3022_v57, -inf  ;;  %2158 = vpow2.f32 %v1186_v17 }
 0x20a   :  { %988 = vmax.xlane.f32.xlu0 %v987_v33  ;;  %1321 = vadd.xlane.f32.xlu2 %v1320_v9  ;;  %v3033_v33 = vpop.eup %2154  ;;  %v1142_v9 = vsub.f32 %v2760_v48, %v1040_v19 }
 0x20b   :  { %1417 = vadd.xlane.f32.xlu1 %v1416_v11  ;;  %3698 = vst [vmem:[#allocation13_spill] sm:$0xff] %v3033_v33  ;;  %v895_v11 = vpop.f32.mrf.mxu3  ;;  %v1323_v24 = vsel %vm905_vm2, %v3033_v33, 0.0  ;;  %v3054_v17 = vpop.eup %2156 }
 0x20c   :  { %v1250_v39 = vmul.f32 1.442695, %v1142_v9  ;;  %v3048_v48 = vadd.f32 %v3045_v6, %v895_v11  ;;  %3700 = vst [vmem:[#allocation15_spill] sm:$0xff] %v3054_v17  ;;  %v3056_v43 = vpop.eup %2158  ;;  %v1111_v9 = vsub.f32 %v2756_v40, %v2991_v35 }
 0x20d   :  { %v3029_v5 = vpop.xlane.xlu2 %1048  ;;  %v3031_v60 = vpop.xlane.xlu1 %955  ;;  %3701 = vst [vmem:[#allocation16_spill] sm:$0xff] %v3056_v43  ;;  %v1326_v57 = vsel %vm905_vm2, %v3056_v43, 0.0 }
 0x20e   :  { %3699 = vst [vmem:[#allocation14_spill] sm:$0xff] %v3048_v48  ;;  %v1086_v11 = vsel %vm905_vm2, %v3048_v48, -inf  ;;  %v1188_v37 = vmul.f32 1.442695, %v1111_v9 }
 0x212   :  { %1324 = vadd.xlane.f32.xlu0 %v1323_v24  ;;  %1084 = vmax.xlane.f32.xlu2 %v1083_v28  ;;  %v1143_v24 = vsub.f32 %v2773_v3, %v1043_v10  ;;  %v1419_v28 = vsel %vm905_vm2, %v3054_v17, 0.0 }
 0x213   :  { %991 = vmax.xlane.f32.xlu1 %v990_v47  ;;  %v817_v47 = vpop.f32.mrf.mxu1  ;;  %v897_v42 = vpop.f32.mrf.mxu3 }
 0x214   :  { %v3068_v35 = vadd.f32 %v3045_v6, %v817_v47  ;;  %v3075_v17 = vadd.f32 %v3045_v6, %v897_v42 }
 0x215   :  { %v3050_v19 = vpop.xlane.xlu2 %958  ;;  %v3052_v50 = vpop.xlane.xlu0 %1051 }
 0x216   :  { %v1292_v33 = vpop.xlane.xlu1 %1291  ;;  %3703 = vst [vmem:[#allocation18_spill] sm:$0xff] %v3075_v17  ;;  %v1089_v42 = vsel %vm905_vm2, %v3075_v17, -inf }
 0x217   :  { %2160 = vrcp.f32 %v1292_v33 }
 0x218   :  { %2162 = vpow2.f32 %v1250_v39  ;;  %v1252_v39 = vmul.f32 1.442695, %v1143_v24  ;;  %v993_v24 = vsel %vm905_vm2, %v3068_v35, -inf }
 0x21a   :  { %1087 = vmax.xlane.f32.xlu0 %v1086_v11  ;;  %1420 = vadd.xlane.f32.xlu2 %v1419_v28 }
 0x21b   :  { %1327 = vadd.xlane.f32.xlu1 %v1326_v57  ;;  %v1112_v57 = vsub.f32 %v2768_v59, %v3005_v63  ;;  %v820_v43 = vpop.f32.mrf.mxu1 }
 0x21d   :  { %v2161_v40 = vpop.eup %2160  ;;  %v1295_v3 = vpop.xlane.xlu2 %1294 }
 0x21e   :  { %v3070_v10 = vpop.xlane.xlu0 %961  ;;  %v3072_v48 = vpop.eup %2162  ;;  %v1546_v11 = vmul.f32 %v2161_v40, %v1292_v33  ;;  %2164 = vrcp.f32 %v1295_v3  ;;  %v1190_v33 = vmul.f32 1.442695, %v1112_v57 }
 0x21f   :  { %3702 = vst [vmem:[#allocation17_spill] sm:$0xff] %v3072_v48  ;;  %v3077_v28 = vpop.xlane.xlu1 %1054  ;;  %2166 = vpow2.f32 %v1188_v37  ;;  %v1422_v47 = vsel %vm905_vm2, %v3072_v48, 0.0 }
 0x220   :  { %v1610_v9 = vsub.f32 2.0, %v1546_v11  ;;  %2168 = vpow2.f32 %v1252_v39  ;;  %v3091_v39 = vadd.f32 %v3045_v6, %v820_v43  ;;  %v1144_v11 = vsub.f32 %v2784_v15, %v3007_v32  ;;  %v900_v43 = vpop.f32.mrf.mxu3 }
 0x222   :  { %v1674_v27 = vmul.f32 %v2161_v40, %v1610_v9  ;;  %1423 = vadd.xlane.f32.xlu0 %v1422_v47  ;;  %994 = vmax.xlane.f32.xlu2 %v993_v24  ;;  %v1254_v32 = vmul.f32 1.442695, %v1144_v11  ;;  %v996_v24 = vsel %vm905_vm2, %v3091_v39, -inf }
 0x223   :  { %1090 = vmax.xlane.f32.xlu1 %v1089_v42 }
 0x224   :  { %v2165_v37 = vpop.eup %2164  ;;  %v1738_v59 = vmul.f32 %v2807_v45, %v1674_v27 }
 0x225   :  { %v3088_v63 = vpop.eup %2166  ;;  %v1547_v48 = vmul.f32 %v2165_v37, %v1295_v3  ;;  %v3095_v40 = vpop.xlane.xlu2 %1057  ;;  %v1113_v3 = vsub.f32 %v2781_v22, %v3024_v25  ;;  %v3121_v22 = vadd.f32 %v3045_v6, %v900_v43 }
 0x226   :  { %v1298_v9 = vpop.xlane.xlu0 %1297  ;;  %1802 = vst.msk [vmem:[%s3668_s5] sm:$0xff] %vm905_vm2, %v1738_v59  ;;  %v3103_v45 = vpop.eup %2168  ;;  %v1329_v15 = vsel %vm905_vm2, %v3088_v63, 0.0 }
 0x227   :  { %v3101_v57 = vpop.xlane.xlu1 %964  ;;  %2170 = vrcp.f32 %v1298_v9  ;;  %v1611_v27 = vsub.f32 2.0, %v1547_v48  ;;  %v1425_v42 = vsel %vm905_vm2, %v3103_v45, 0.0  ;;  %v822_v59 = vpop.f32.mrf.mxu1  ;;  %v1192_v11 = vmul.f32 1.442695, %v1113_v3  ;;  %3704 = vst [vmem:[#allocation19_spill] sm:$0xff] %v3121_v22 }
 0x228   :  { %2172 = vpow2.f32 %v1190_v33 }
 0x229   :  { %v1675_v47 = vmul.f32 %v2165_v37, %v1611_v27  ;;  %2174 = vpow2.f32 %v1254_v32  ;;  %v1145_v32 = vsub.f32 %v2797_v34, %v3029_v5 }
 0x22a   :  { %997 = vmax.xlane.f32.xlu0 %v996_v24  ;;  %1330 = vadd.xlane.f32.xlu2 %v1329_v15  ;;  %v1092_v24 = vsel %vm905_vm2, %v3121_v22, -inf }
 0x22b   :  { %v1739_v33 = vmul.f32 %v2822_v62, %v1675_v47  ;;  %1426 = vadd.xlane.f32.xlu1 %v1425_v42  ;;  %v3126_v62 = vadd.f32 %v3045_v6, %v822_v59  ;;  %v902_v42 = vpop.f32.mrf.mxu3 }
 0x22d   :  { %v2171_v48 = vpop.eup %2170  ;;  %1803 = vst.msk [vmem:[%s3668_s5 + $0x8] sm:$0xff] %vm905_vm2, %v1739_v33  ;;  %v1394_v37 = vpop.xlane.xlu2 %1393  ;;  %v999_v33 = vsel %vm905_vm2, %v3126_v62, -inf }
 0x22e   :  { %v3114_v17 = vpop.eup %2172  ;;  %v1548_v25 = vmul.f32 %v2171_v48, %v1298_v9  ;;  %v3123_v27 = vpop.xlane.xlu0 %1060  ;;  %2176 = vrcp.f32 %v1394_v37  ;;  %v1146_v9 = vsub.f32 %v2810_v44, %v3052_v50  ;;  %v1114_v44 = vsub.f32 %v2792_v29, %v3031_v60 }
 0x22f   :  { %v1301_v15 = vpop.xlane.xlu1 %1300  ;;  %v1332_v3 = vsel %vm905_vm2, %v3114_v17, 0.0  ;;  %v3138_v59 = vpop.eup %2174 }
 0x230   :  { %v1612_v47 = vsub.f32 2.0, %v1548_v25  ;;  %2178 = vrcp.f32 %v1301_v15  ;;  %v3148_v25 = vadd.f32 %v3045_v6, %v902_v42  ;;  %v825_v29 = vpop.f32.mrf.mxu1 }
 0x231   :  { %2180 = vpow2.f32 %v1192_v11  ;;  %v1256_v11 = vmul.f32 1.442695, %v1145_v32 }
 0x232   :  { %v1676_v43 = vmul.f32 %v2171_v48, %v1612_v47  ;;  %1333 = vadd.xlane.f32.xlu0 %v1332_v3  ;;  %1093 = vmax.xlane.f32.xlu2 %v1092_v24  ;;  %v1258_v48 = vmul.f32 1.442695, %v1146_v9  ;;  %v1194_v9 = vmul.f32 1.442695, %v1114_v44 }
 0x233   :  { %1000 = vmax.xlane.f32.xlu1 %v999_v33 }
 0x234   :  { %v1740_v34 = vmul.f32 %v2835_v1, %v1676_v43  ;;  %v2177_v5 = vpop.eup %2176 }
 0x235   :  { %v1580_v47 = vmul.f32 %v2177_v5, %v1394_v37  ;;  %v3150_v3 = vpop.xlane.xlu2 %967  ;;  %v1116_v37 = vsub.f32 %v2820_v61, %v3070_v10 }
 0x236   :  { %v2179_v50 = vpop.eup %2178  ;;  %1804 = vst.msk [vmem:[%s3668_s5 + $0x10] sm:$0xff] %vm905_vm2, %v1740_v34  ;;  %v1397_v1 = vpop.xlane.xlu0 %1396  ;;  %v1428_v34 = vsel %vm905_vm2, %v3138_v59, 0.0 }
 0x237   :  { %v1549_v43 = vmul.f32 %v2179_v50, %v1301_v15  ;;  %v3152_v24 = vpop.xlane.xlu1 %1063  ;;  %2182 = vrcp.f32 %v1397_v1  ;;  %v3154_v32 = vpop.eup %2180  ;;  %v1644_v60 = vsub.f32 2.0, %v1580_v47  ;;  %v1095_v15 = vsel %vm905_vm2, %v3148_v25, -inf }
 0x238   :  { %2184 = vpow2.f32 %v1256_v11  ;;  %v1335_v47 = vsel %vm905_vm2, %v3154_v32, 0.0  ;;  %v1198_v61 = vmul.f32 1.442695, %v1116_v37 }
 0x239   :  { %v1613_v33 = vsub.f32 2.0, %v1549_v43  ;;  %2186 = vpow2.f32 %v1258_v48  ;;  %v1708_v42 = vmul.f32 %v2177_v5, %v1644_v60  ;;  %v3166_v43 = vadd.f32 %v3045_v6, %v825_v29 }
 0x23a   :  { %1096 = vmax.xlane.f32.xlu0 %v1095_v15  ;;  %1429 = vadd.xlane.f32.xlu2 %v1428_v34  ;;  %2188 = vpow2.f32 %v1194_v9  ;;  %v1149_v34 = vsub.f32 %v2855_v51, %v3123_v27 }
 0x23b   :  { %v1677_v22 = vmul.f32 %v2179_v50, %v1613_v33  ;;  %v1772_v11 = vmul.f32 %v2850_v41, %v1708_v42  ;;  %1336 = vadd.xlane.f32.xlu1 %v1335_v47  ;;  %v1002_v9 = vsel %vm905_vm2, %v3166_v43, -inf  ;;  %v827_v33 = vpop.f32.mrf.mxu1 }
 0x23c   :  { %v3197_v47 = vadd.f32 %v3045_v6, %v827_v33 }
 0x23d   :  { %v2183_v44 = vpop.eup %2182  ;;  %v1741_v48 = vmul.f32 %v2852_v49, %v1677_v22  ;;  %1836 = vst.msk [vmem:[%s3668_s5 + $0x110] sm:$0xff] %vm905_vm2, %v1772_v11  ;;  %v1304_v5 = vpop.xlane.xlu2 %1303  ;;  %v1115_v22 = vsub.f32 %v2805_v38, %v3050_v19  ;;  %v1148_v11 = vsub.f32 %v2841_v26, %v3095_v40  ;;  %v1117_v40 = vsub.f32 %v2838_v21, %v3101_v57 }
 0x23e   :  { %v1581_v10 = vmul.f32 %v2183_v44, %v1397_v1  ;;  %v971_v50 = vpop.xlane.xlu0 %970  ;;  %v3173_v60 = vpop.eup %2184  ;;  %2190 = vrcp.f32 %v1304_v5  ;;  %v1147_v1 = vsub.f32 %v2825_v0, %v3077_v28 }
 0x23f   :  { %1805 = vst.msk [vmem:[%s3668_s5 + $0x18] sm:$0xff] %vm905_vm2, %v1741_v48  ;;  %v1400_v41 = vpop.xlane.xlu1 %1399  ;;  %v3179_v49 = vpop.eup %2186  ;;  %v1431_v42 = vsel %vm905_vm2, %v3173_v60, 0.0  ;;  %v1196_v0 = vmul.f32 1.442695, %v1115_v22  ;;  %v1119_v33 = vsub.f32 %v2881_v23, %v971_v50  ;;  %v1200_v21 = vmul.f32 1.442695, %v1117_v40 }
 0x240   :  { %v1645_v29 = vsub.f32 2.0, %v1581_v10  ;;  %2192 = vrcp.f32 %v1400_v41  ;;  %v1434_v38 = vsel %vm905_vm2, %v3179_v49, 0.0  ;;  %v3193_v19 = vpop.eup %2188  ;;  %v1260_v51 = vmul.f32 1.442695, %v1147_v1 }
 0x241   :  { %2194 = vpow2.f32 %v1198_v61  ;;  %v1338_v26 = vsel %vm905_vm2, %v3193_v19, 0.0  ;;  %v1204_v23 = vmul.f32 1.442695, %v1119_v33 }
 0x242   :  { %v1709_v37 = vmul.f32 %v2183_v44, %v1645_v29  ;;  %1432 = vadd.xlane.f32.xlu0 %v1431_v42  ;;  %1003 = vmax.xlane.f32.xlu2 %v1002_v9  ;;  %v1264_v44 = vmul.f32 1.442695, %v1149_v34  ;;  %v1262_v9 = vmul.f32 1.442695, %v1148_v11 }
 0x243   :  { %1435 = vadd.xlane.f32.xlu1 %v1434_v38 }
 0x244   :  { %v1773_v28 = vmul.f32 %v2868_v7, %v1709_v37  ;;  %v2191_v15 = vpop.eup %2190 }
 0x245   :  { %v1550_v48 = vmul.f32 %v2191_v15, %v1304_v5  ;;  %v3205_v61 = vpop.xlane.xlu2 %1066  ;;  %v1005_v5 = vsel %vm905_vm2, %v3197_v47, -inf }
 0x246   :  { %v2193_v27 = vpop.eup %2192  ;;  %1837 = vst.msk [vmem:[%s3668_s5 + $0x118] sm:$0xff] %vm905_vm2, %v1773_v28  ;;  %v1307_v7 = vpop.xlane.xlu0 %1306 }
 0x247   :  { %v1582_v10 = vmul.f32 %v2193_v27, %v1400_v41  ;;  %v3207_v22 = vpop.xlane.xlu1 %973  ;;  %2196 = vrcp.f32 %v1307_v7  ;;  %v3209_v6 = vpop.eup %2194  ;;  %v1614_v29 = vsub.f32 2.0, %v1550_v48 }
 0x248   :  { %2198 = vpow2.f32 %v1196_v0  ;;  %v1344_v37 = vsel %vm905_vm2, %v3209_v6, 0.0 }
 0x249   :  { %2200 = vpow2.f32 %v1260_v51  ;;  %v1646_v1 = vsub.f32 2.0, %v1582_v10  ;;  %v1678_v41 = vmul.f32 %v2191_v15, %v1614_v29 }
 0x24a   :  { %2202 = vpow2.f32 %v1264_v44  ;;  %1006 = vmax.xlane.f32.xlu0 %v1005_v5  ;;  %1339 = vadd.xlane.f32.xlu2 %v1338_v26  ;;  %v1150_v44 = vsub.f32 %v2871_v8, %v3152_v24 }
 0x24b   :  { %v1710_v34 = vmul.f32 %v2193_v27, %v1646_v1  ;;  %v1742_v42 = vmul.f32 %v2883_v36, %v1678_v41  ;;  %1345 = vadd.xlane.f32.xlu1 %v1344_v37  ;;  %2204 = vpow2.f32 %v1262_v9  ;;  %v1118_v27 = vsub.f32 %v2866_v4, %v3150_v3 }
 0x24c   :  { %v1266_v40 = vmul.f32 1.442695, %v1150_v44 }
 0x24d   :  { %v2197_v38 = vpop.eup %2196  ;;  %v1774_v57 = vmul.f32 %v2885_v31, %v1710_v34  ;;  %1806 = vst.msk [vmem:[%s3668_s5 + $0x20] sm:$0xff] %vm905_vm2, %v1742_v42  ;;  %v1403_v28 = vpop.xlane.xlu2 %1402  ;;  %v1202_v26 = vmul.f32 1.442695, %v1118_v27 }
 0x24e   :  { %v3222_v0 = vpop.eup %2198  ;;  %v1551_v50 = vmul.f32 %v2197_v38, %v1307_v7  ;;  %v1070_v15 = vpop.xlane.xlu0 %1069  ;;  %2206 = vrcp.f32 %v1403_v28 }
 0x24f   :  { %v3228_v51 = vpop.eup %2200  ;;  %1838 = vst.msk [vmem:[%s3668_s5 + $0x120] sm:$0xff] %vm905_vm2, %v1774_v57  ;;  %v1310_v36 = vpop.xlane.xlu1 %1309  ;;  %v1341_v48 = vsel %vm905_vm2, %v3222_v0, 0.0  ;;  %v1152_v10 = vsub.f32 %v2911_v16, %v1070_v15  ;;  %v1151_v16 = vsub.f32 %v2899_v46, %v3205_v61  ;;  %v1120_v46 = vsub.f32 %v2896_v56, %v3207_v22 }
 0x250   :  { %v3234_v31 = vpop.eup %2202  ;;  %v1615_v11 = vsub.f32 2.0, %v1551_v50  ;;  %2208 = vrcp.f32 %v1310_v36  ;;  %v1437_v29 = vsel %vm905_vm2, %v3228_v51, 0.0 }
 0x251   :  { %2210 = vpow2.f32 %v1200_v21  ;;  %v1443_v4 = vsel %vm905_vm2, %v3234_v31, 0.0  ;;  %v3247_v3 = vpop.eup %2204  ;;  %v1270_v9 = vmul.f32 1.442695, %v1152_v10  ;;  %v1268_v57 = vmul.f32 1.442695, %v1151_v16 }
 0x252   :  { %2212 = vpow2.f32 %v1204_v23  ;;  %v1679_v7 = vmul.f32 %v2197_v38, %v1615_v11  ;;  %1342 = vadd.xlane.f32.xlu0 %v1341_v48  ;;  %1438 = vadd.xlane.f32.xlu2 %v1437_v29  ;;  %v1440_v21 = vsel %vm905_vm2, %v3247_v3, 0.0  ;;  %v1206_v22 = vmul.f32 1.442695, %v1120_v46 }
 0x253   :  { %1444 = vadd.xlane.f32.xlu1 %v1443_v4 }
 0x254   :  { %v1743_v8 = vmul.f32 %v2901_v58, %v1679_v7  ;;  %v2207_v24 = vpop.eup %2206 }
 0x255   :  { %v1583_v5 = vmul.f32 %v2207_v24, %v1403_v28  ;;  %v977_v41 = vpop.xlane.xlu2 %976 }
 0x256   :  { %v2209_v1 = vpop.eup %2208  ;;  %1807 = vst.msk [vmem:[%s3668_s5 + $0x28] sm:$0xff] %vm905_vm2, %v1743_v8  ;;  %v1406_v33 = vpop.xlane.xlu0 %1405  ;;  %v1121_v4 = vsub.f32 %v2926_v54, %v977_v41 }
 0x257   :  { %v3256_v34 = vpop.eup %2210  ;;  %v1552_v37 = vmul.f32 %v2209_v1, %v1310_v36  ;;  %v1073_v58 = vpop.xlane.xlu1 %1072  ;;  %2214 = vrcp.f32 %v1406_v33  ;;  %v1647_v38 = vsub.f32 2.0, %v1583_v5 }
 0x258   :  { %v3258_v42 = vpop.eup %2212  ;;  %2216 = vpow2.f32 %v1202_v26  ;;  %v1347_v50 = vsel %vm905_vm2, %v3256_v34, 0.0  ;;  %v1153_v8 = vsub.f32 %v2931_v52, %v1073_v58  ;;  %v1208_v5 = vmul.f32 1.442695, %v1121_v4 }
 0x259   :  { %2218 = vpow2.f32 %v1266_v40  ;;  %v1616_v61 = vsub.f32 2.0, %v1552_v37  ;;  %v1711_v23 = vmul.f32 %v2207_v24, %v1647_v38  ;;  %v1353_v15 = vsel %vm905_vm2, %v3258_v42, 0.0 }
 0x25a   :  { %2220 = vpow2.f32 %v1270_v9  ;;  %1348 = vadd.xlane.f32.xlu2 %v1347_v50  ;;  %1441 = vadd.xlane.f32.xlu0 %v1440_v21  ;;  %v1272_v41 = vmul.f32 1.442695, %v1153_v8 }
 0x25b   :  { %v1680_v28 = vmul.f32 %v2209_v1, %v1616_v61  ;;  %v1775_v36 = vmul.f32 %v2913_v2, %v1711_v23  ;;  %1354 = vadd.xlane.f32.xlu1 %v1353_v15  ;;  %2222 = vpow2.f32 %v1268_v57 }
 0x25d   :  { %v2215_v56 = vpop.eup %2214  ;;  %v1744_v27 = vmul.f32 %v2915_v20, %v1680_v28  ;;  %1839 = vst.msk [vmem:[%s3668_s5 + $0x128] sm:$0xff] %vm905_vm2, %v1775_v36  ;;  %v1313_v48 = vpop.xlane.xlu2 %1312 }
 0x25e   :  { %v3270_v11 = vpop.eup %2216  ;;  %v1584_v44 = vmul.f32 %v2215_v56, %v1406_v33  ;;  %v980_v7 = vpop.xlane.xlu0 %979  ;;  %2224 = vrcp.f32 %v1313_v48 }
 0x25f   :  { %v3276_v10 = vpop.eup %2218  ;;  %1808 = vst.msk [vmem:[%s3668_s5 + $0x30] sm:$0xff] %vm905_vm2, %v1744_v27  ;;  %v1409_v2 = vpop.xlane.xlu1 %1408  ;;  %v1122_v20 = vsub.f32 %v2941_v14, %v980_v7  ;;  %v1350_v16 = vsel %vm905_vm2, %v3270_v11, 0.0 }
 0x260   :  { %v3283_v29 = vpop.eup %2220  ;;  %v1648_v26 = vsub.f32 2.0, %v1584_v44  ;;  %2226 = vrcp.f32 %v1409_v2  ;;  %v1446_v1 = vsel %vm905_vm2, %v3276_v10, 0.0 }
 0x261   :  { %2228 = vpow2.f32 %v1206_v22  ;;  %v1210_v24 = vmul.f32 1.442695, %v1122_v20  ;;  %v1452_v14 = vsel %vm905_vm2, %v3283_v29, 0.0  ;;  %v3293_v54 = vpop.eup %2222 }
 0x262   :  { %v1712_v40 = vmul.f32 %v2215_v56, %v1648_v26  ;;  %1447 = vadd.xlane.f32.xlu2 %v1446_v1  ;;  %1351 = vadd.xlane.f32.xlu0 %v1350_v16  ;;  %v1449_v15 = vsel %vm905_vm2, %v3293_v54, 0.0 }
 0x263   :  { %2230 = vpow2.f32 %v1210_v24  ;;  %1453 = vadd.xlane.f32.xlu1 %v1452_v14 }
 0x264   :  { %v1776_v9 = vmul.f32 %v2928_v18, %v1712_v40  ;;  %v2225_v52 = vpop.eup %2224 }
 0x265   :  { %v1553_v37 = vmul.f32 %v2225_v52, %v1313_v48  ;;  %v1076_v58 = vpop.xlane.xlu2 %1075 }
 0x266   :  { %v2227_v33 = vpop.eup %2226  ;;  %1840 = vst.msk [vmem:[%s3668_s5 + $0x130] sm:$0xff] %vm905_vm2, %v1776_v9  ;;  %v1316_v38 = vpop.xlane.xlu0 %1315  ;;  %v1154_v21 = vsub.f32 %v2956_v55, %v1076_v58  ;;  %v3705_v9 = vld [vmem:[#allocation2_spill] sm:$0xff] }
 0x267   :  { %v3300_v46 = vpop.eup %2228  ;;  %v1585_v61 = vmul.f32 %v2227_v33, %v1409_v2  ;;  %v983_v57 = vpop.xlane.xlu1 %982  ;;  %2232 = vrcp.f32 %v1316_v38  ;;  %v1617_v18 = vsub.f32 2.0, %v1553_v37 }
 0x268   :  { %2234 = vpow2.f32 %v1208_v5  ;;  %v1123_v28 = vsub.f32 %v2961_v13, %v983_v57  ;;  %v1274_v56 = vmul.f32 1.442695, %v1154_v21  ;;  %v1356_v22 = vsel %vm905_vm2, %v3300_v46, 0.0  ;;  %v3706_v21 = vld [vmem:[#allocation6_spill] sm:$0xff] }
 0x269   :  { %v3303_v23 = vpop.eup %2230  ;;  %2236 = vpow2.f32 %v1272_v41  ;;  %v1649_v50 = vsub.f32 2.0, %v1585_v61  ;;  %v1681_v36 = vmul.f32 %v2225_v52, %v1617_v18 }
 0x26a   :  { %v1362_v55 = vsel %vm905_vm2, %v3303_v23, 0.0  ;;  %1450 = vadd.xlane.f32.xlu0 %v1449_v15  ;;  %1357 = vadd.xlane.f32.xlu2 %v1356_v22  ;;  %v1212_v7 = vmul.f32 1.442695, %v1123_v28  ;;  %2238 = vpow2.f32 %v1274_v56  ;;  %v3707_v28 = vld [vmem:[#allocation5_spill] sm:$0xff] }
 0x26b   :  { %v1713_v27 = vmul.f32 %v2227_v33, %v1649_v50  ;;  %v1745_v44 = vmul.f32 %v2943_v12, %v1681_v36  ;;  %1363 = vadd.xlane.f32.xlu1 %v1362_v55 }
 0x26d   :  { %v2233_v48 = vpop.eup %2232  ;;  %v1777_v13 = vmul.f32 %v2945_v30, %v1713_v27  ;;  %1809 = vst.msk [vmem:[%s3668_s5 + $0x38] sm:$0xff] %vm905_vm2, %v1745_v44  ;;  %v1412_v4 = vpop.xlane.xlu2 %1411 }
 0x26e   :  { %v3314_v2 = vpop.eup %2234  ;;  %v1554_v20 = vmul.f32 %v2233_v48, %v1316_v38  ;;  %v1079_v26 = vpop.xlane.xlu0 %1078  ;;  %2240 = vrcp.f32 %v1412_v4 }
 0x26f   :  { %v3320_v8 = vpop.eup %2236  ;;  %1841 = vst.msk [vmem:[%s3668_s5 + $0x138] sm:$0xff] %vm905_vm2, %v1777_v13  ;;  %v1319_v12 = vpop.xlane.xlu1 %1318  ;;  %v1155_v30 = vsub.f32 %v2971_v53, %v1079_v26  ;;  %v1359_v16 = vsel %vm905_vm2, %v3314_v2, 0.0 }
 0x270   :  { %v1618_v24 = vsub.f32 2.0, %v1554_v20  ;;  %2242 = vrcp.f32 %v1319_v12  ;;  %v1455_v14 = vsel %vm905_vm2, %v3320_v8, 0.0  ;;  %v3331_v5 = vpop.eup %2238  ;;  %v3708_v20 = vld [vmem:[#allocation3_spill] sm:$0xff] }
 0x271   :  { %2244 = vpow2.f32 %v1212_v7  ;;  %v1276_v40 = vmul.f32 1.442695, %v1155_v30  ;;  %v1458_v55 = vsel %vm905_vm2, %v3331_v5, 0.0 }
 0x272   :  { %v1682_v1 = vmul.f32 %v2233_v48, %v1618_v24  ;;  %1360 = vadd.xlane.f32.xlu0 %v1359_v16  ;;  %1456 = vadd.xlane.f32.xlu2 %v1455_v14  ;;  %v3710_v14 = vld [vmem:[#allocation8_spill] sm:$0xff] }
 0x273   :  { %2246 = vpow2.f32 %v1276_v40 }
 0x274   :  { %v1746_v52 = vmul.f32 %v3705_v9, %v1682_v1  ;;  %v2241_v41 = vpop.eup %2240 }
 0x275   :  { %v1586_v33 = vmul.f32 %v2241_v41, %v1412_v4  ;;  %v986_v37 = vpop.xlane.xlu2 %985 }
 0x276   :  { %v2243_v53 = vpop.eup %2242  ;;  %1810 = vst.msk [vmem:[%s3668_s5 + $0x40] sm:$0xff] %vm905_vm2, %v1746_v52  ;;  %v1415_v58 = vpop.xlane.xlu0 %1414  ;;  %v1124_v57 = vsub.f32 %v3706_v21, %v986_v37  ;;  %v3711_v21 = vld [vmem:[#allocation7_spill] sm:$0xff] }
 0x277   :  { %v3338_v38 = vpop.eup %2244  ;;  %v1555_v61 = vmul.f32 %v2243_v53, %v1319_v12  ;;  %v1082_v18 = vpop.xlane.xlu1 %1081  ;;  %2248 = vrcp.f32 %v1415_v58  ;;  %v1650_v50 = vsub.f32 2.0, %v1586_v33  ;;  %v3709_v12 = vld [vmem:[#allocation4_spill] sm:$0xff] }
 0x278   :  { %v1156_v15 = vsub.f32 %v3707_v28, %v1082_v18  ;;  %v1214_v22 = vmul.f32 1.442695, %v1124_v57  ;;  %v1365_v48 = vsel %vm905_vm2, %v3338_v38, 0.0 }
 0x279   :  { %v3342_v36 = vpop.eup %2246  ;;  %v1619_v56 = vsub.f32 2.0, %v1555_v61  ;;  %v1714_v27 = vmul.f32 %v2241_v41, %v1650_v50 }
 0x27a   :  { %v1278_v44 = vmul.f32 1.442695, %v1156_v15  ;;  %v1461_v13 = vsel %vm905_vm2, %v3342_v36, 0.0  ;;  %2250 = vpow2.f32 %v1214_v22  ;;  %1459 = vadd.xlane.f32.xlu0 %v1458_v55  ;;  %1366 = vadd.xlane.f32.xlu2 %v1365_v48  ;;  %v3712_v55 = vld [vmem:[#allocation12_spill] sm:$0xff] }
 0x27b   :  { %v1683_v7 = vmul.f32 %v2243_v53, %v1619_v56  ;;  %v1778_v4 = vmul.f32 %v3708_v20, %v1714_v27  ;;  %1462 = vadd.xlane.f32.xlu1 %v1461_v13  ;;  %v3713_v13 = vld [vmem:[#allocation11_spill] sm:$0xff] }
 0x27c   :  { %2252 = vpow2.f32 %v1278_v44 }
 0x27d   :  { %v2249_v26 = vpop.eup %2248  ;;  %v1747_v30 = vmul.f32 %v3709_v12, %v1683_v7  ;;  %1842 = vst.msk [vmem:[%s3668_s5 + $0x140] sm:$0xff] %vm905_vm2, %v1778_v4  ;;  %v1322_v40 = vpop.xlane.xlu2 %1321 }
 0x27e   :  { %v1587_v24 = vmul.f32 %v2249_v26, %v1415_v58  ;;  %v989_v1 = vpop.xlane.xlu0 %988  ;;  %2254 = vrcp.f32 %v1322_v40 }
 0x27f   :  { %1811 = vst.msk [vmem:[%s3668_s5 + $0x48] sm:$0xff] %vm905_vm2, %v1747_v30  ;;  %v1418_v16 = vpop.xlane.xlu1 %1417  ;;  %v1125_v9 = vsub.f32 %v3710_v14, %v989_v1  ;;  %v3714_v1 = vld [vmem:[#allocation9_spill] sm:$0xff] }
 0x280   :  { %v1651_v52 = vsub.f32 2.0, %v1587_v24  ;;  %2256 = vrcp.f32 %v1418_v16  ;;  %v3361_v41 = vpop.eup %2250 }
 0x281   :  { %v1216_v53 = vmul.f32 1.442695, %v1125_v9  ;;  %v1368_v58 = vsel %vm905_vm2, %v3361_v41, 0.0  ;;  %v3715_v9 = vld [vmem:[#allocation10_spill] sm:$0xff] }
 0x282   :  { %v3363_v33 = vpop.eup %2252  ;;  %v1715_v37 = vmul.f32 %v2249_v26, %v1651_v52  ;;  %1369 = vadd.xlane.f32.xlu0 %v1368_v58 }
 0x283   :  { %2258 = vpow2.f32 %v1216_v53  ;;  %v1464_v61 = vsel %vm905_vm2, %v3363_v33, 0.0 }
 0x284   :  { %v1779_v57 = vmul.f32 %v3711_v21, %v1715_v37  ;;  %1465 = vadd.xlane.f32.xlu2 %v1464_v61  ;;  %v2255_v18 = vpop.eup %2254  ;;  %v3716_v21 = vld [vmem:[#allocation14_spill] sm:$0xff] }
 0x285   :  { %v1556_v28 = vmul.f32 %v2255_v18, %v1322_v40  ;;  %v1085_v15 = vpop.xlane.xlu2 %1084 }
 0x286   :  { %v2257_v50 = vpop.eup %2256  ;;  %1843 = vst.msk [vmem:[%s3668_s5 + $0x148] sm:$0xff] %vm905_vm2, %v1779_v57  ;;  %v1325_v56 = vpop.xlane.xlu0 %1324  ;;  %v1157_v27 = vsub.f32 %v3712_v55, %v1085_v15 }
 0x287   :  { %v1588_v22 = vmul.f32 %v2257_v50, %v1418_v16  ;;  %v992_v44 = vpop.xlane.xlu1 %991  ;;  %2260 = vrcp.f32 %v1325_v56  ;;  %v1620_v48 = vsub.f32 2.0, %v1556_v28 }
 0x288   :  { %v1126_v7 = vsub.f32 %v3713_v13, %v992_v44  ;;  %v1280_v26 = vmul.f32 1.442695, %v1157_v27  ;;  %v3717_v27 = vld [vmem:[#allocation13_spill] sm:$0xff] }
 0x289   :  { %v3376_v20 = vpop.eup %2258  ;;  %v1652_v4 = vsub.f32 2.0, %v1588_v22  ;;  %v1684_v12 = vmul.f32 %v2255_v18, %v1620_v48 }
 0x28a   :  { %v1218_v30 = vmul.f32 1.442695, %v1126_v7  ;;  %v1371_v24 = vsel %vm905_vm2, %v3376_v20, 0.0  ;;  %2262 = vpow2.f32 %v1280_v26 }
 0x28b   :  { %v1716_v40 = vmul.f32 %v2257_v50, %v1652_v4  ;;  %1372 = vadd.xlane.f32.xlu1 %v1371_v24  ;;  %v1748_v16 = vmul.f32 %v3714_v1, %v1684_v12 }
 0x28c   :  { %2264 = vpow2.f32 %v1218_v30 }
 0x28d   :  { %v2261_v14 = vpop.eup %2260  ;;  %v1780_v52 = vmul.f32 %v3715_v9, %v1716_v40  ;;  %1812 = vst.msk [vmem:[%s3668_s5 + $0x50] sm:$0xff] %vm905_vm2, %v1748_v16  ;;  %v1421_v37 = vpop.xlane.xlu2 %1420 }
 0x28e   :  { %v1557_v53 = vmul.f32 %v2261_v14, %v1325_v56  ;;  %v1088_v58 = vpop.xlane.xlu0 %1087  ;;  %2266 = vrcp.f32 %v1421_v37 }
 0x28f   :  { %1844 = vst.msk [vmem:[%s3668_s5 + $0x150] sm:$0xff] %vm905_vm2, %v1780_v52  ;;  %v1328_v61 = vpop.xlane.xlu1 %1327  ;;  %v1158_v57 = vsub.f32 %v3716_v21, %v1088_v58 }
 0x290   :  { %v1621_v18 = vsub.f32 2.0, %v1557_v53  ;;  %2268 = vrcp.f32 %v1328_v61  ;;  %v3391_v50 = vpop.eup %2262 }
 0x291   :  { %v1282_v28 = vmul.f32 1.442695, %v1158_v57  ;;  %v1467_v56 = vsel %vm905_vm2, %v3391_v50, 0.0 }
 0x292   :  { %v3393_v15 = vpop.eup %2264  ;;  %v1685_v22 = vmul.f32 %v2261_v14, %v1621_v18  ;;  %1468 = vadd.xlane.f32.xlu0 %v1467_v56 }
 0x293   :  { %2270 = vpow2.f32 %v1282_v28  ;;  %v1374_v55 = vsel %vm905_vm2, %v3393_v15, 0.0 }
 0x294   :  { %v1749_v44 = vmul.f32 %v3717_v27, %v1685_v22  ;;  %1375 = vadd.xlane.f32.xlu2 %v1374_v55  ;;  %v2267_v48 = vpop.eup %2266 }
 0x295   :  { %v1589_v7 = vmul.f32 %v2267_v48, %v1421_v37  ;;  %v995_v4 = vpop.xlane.xlu2 %994  ;;  %v3718_v37 = vld [vmem:[#allocation15_spill] sm:$0xff] }
 0x296   :  { %v2269_v13 = vpop.eup %2268  ;;  %1813 = vst.msk [vmem:[%s3668_s5 + $0x58] sm:$0xff] %vm905_vm2, %v1749_v44  ;;  %v1424_v26 = vpop.xlane.xlu0 %1423  ;;  %v1127_v30 = vsub.f32 %v3068_v35, %v995_v4 }
 0x297   :  { %v1558_v12 = vmul.f32 %v2269_v13, %v1328_v61  ;;  %v1091_v24 = vpop.xlane.xlu1 %1090  ;;  %2272 = vrcp.f32 %v1424_v26  ;;  %v1653_v40 = vsub.f32 2.0, %v1589_v7  ;;  %v3719_v61 = vld [vmem:[#allocation16_spill] sm:$0xff]  ;;  %v3720_v7 = vld [vmem:[#allocation17_spill] sm:$0xff] }
 0x298   :  { %v1220_v14 = vmul.f32 1.442695, %v1127_v30 }
 0x299   :  { %v3405_v1 = vpop.eup %2270  ;;  %v1622_v16 = vsub.f32 2.0, %v1558_v12  ;;  %v1717_v9 = vmul.f32 %v2267_v48, %v1653_v40 }
 0x29a   :  { %v1470_v52 = vsel %vm905_vm2, %v3405_v1, 0.0  ;;  %2274 = vpow2.f32 %v1220_v14 }
 0x29b   :  { %v1686_v53 = vmul.f32 %v2269_v13, %v1622_v16  ;;  %1471 = vadd.xlane.f32.xlu1 %v1470_v52  ;;  %v1781_v58 = vmul.f32 %v3718_v37, %v1717_v9 }
 0x29d   :  { %v2273_v21 = vpop.eup %2272  ;;  %v1750_v57 = vmul.f32 %v3719_v61, %v1686_v53  ;;  %1845 = vst.msk [vmem:[%s3668_s5 + $0x158] sm:$0xff] %vm905_vm2, %v1781_v58  ;;  %v1331_v18 = vpop.xlane.xlu2 %1330  ;;  %v3721_v58 = vld [vmem:[#allocation18_spill] sm:$0xff] }
 0x29e   :  { %v1590_v35 = vmul.f32 %v2273_v21, %v1424_v26  ;;  %v998_v28 = vpop.xlane.xlu0 %997  ;;  %2276 = vrcp.f32 %v1331_v18 }
 0x29f   :  { %1814 = vst.msk [vmem:[%s3668_s5 + $0x60] sm:$0xff] %vm905_vm2, %v1750_v57  ;;  %v1427_v22 = vpop.xlane.xlu1 %1426  ;;  %v1128_v56 = vsub.f32 %v3091_v39, %v998_v28 }
 0x2a0   :  { %v1654_v55 = vsub.f32 2.0, %v1590_v35  ;;  %2278 = vrcp.f32 %v1427_v22  ;;  %v3420_v27 = vpop.eup %2274 }
 0x2a1   :  { %v1222_v44 = vmul.f32 1.442695, %v1128_v56  ;;  %v1377_v13 = vsel %vm905_vm2, %v3420_v27, 0.0 }
 0x2a2   :  { %v1718_v48 = vmul.f32 %v2273_v21, %v1654_v55  ;;  %1378 = vadd.xlane.f32.xlu0 %v1377_v13  ;;  %v1159_v21 = vsub.f32 %v3721_v58, %v1091_v24 }
 0x2a3   :  { %2280 = vpow2.f32 %v1222_v44 }
 0x2a4   :  { %v1782_v4 = vmul.f32 %v3720_v7, %v1718_v48  ;;  %v2277_v26 = vpop.eup %2276  ;;  %v1284_v55 = vmul.f32 1.442695, %v1159_v21 }
 0x2a5   :  { %v1559_v39 = vmul.f32 %v2277_v26, %v1331_v18  ;;  %v1094_v30 = vpop.xlane.xlu2 %1093 }
 0x2a6   :  { %v2279_v12 = vpop.eup %2278  ;;  %1846 = vst.msk [vmem:[%s3668_s5 + $0x160] sm:$0xff] %vm905_vm2, %v1782_v4  ;;  %v1334_v40 = vpop.xlane.xlu0 %1333 }
 0x2a7   :  { %v1591_v16 = vmul.f32 %v2279_v12, %v1427_v22  ;;  %v1001_v14 = vpop.xlane.xlu1 %1000  ;;  %2282 = vrcp.f32 %v1334_v40  ;;  %v1623_v9 = vsub.f32 2.0, %v1559_v39 }
 0x2a8   :  { %v1129_v52 = vsub.f32 %v3126_v62, %v1001_v14 }
 0x2a9   :  { %v3430_v53 = vpop.eup %2280  ;;  %v1655_v37 = vsub.f32 2.0, %v1591_v16  ;;  %v1687_v61 = vmul.f32 %v2277_v26, %v1623_v9 }
 0x2aa   :  { %v1224_v57 = vmul.f32 1.442695, %v1129_v52  ;;  %v1380_v35 = vsel %vm905_vm2, %v3430_v53, 0.0 }
 0x2ab   :  { %v1719_v28 = vmul.f32 %v2279_v12, %v1655_v37  ;;  %1381 = vadd.xlane.f32.xlu1 %v1380_v35  ;;  %v1751_v18 = vmul.f32 %v3088_v63, %v1687_v61 }
 0x2ac   :  { %2284 = vpow2.f32 %v1224_v57 }
 0x2ad   :  { %v2283_v22 = vpop.eup %2282  ;;  %v1783_v56 = vmul.f32 %v3103_v45, %v1719_v28  ;;  %1815 = vst.msk [vmem:[%s3668_s5 + $0x68] sm:$0xff] %vm905_vm2, %v1751_v18  ;;  %v1430_v24 = vpop.xlane.xlu2 %1429 }
 0x2ae   :  { %v1560_v62 = vmul.f32 %v2283_v22, %v1334_v40  ;;  %v1097_v44 = vpop.xlane.xlu0 %1096  ;;  %2286 = vrcp.f32 %v1430_v24 }
 0x2af   :  { %1847 = vst.msk [vmem:[%s3668_s5 + $0x168] sm:$0xff] %vm905_vm2, %v1783_v56  ;;  %v1337_v63 = vpop.xlane.xlu1 %1336 }
 0x2b0   :  { %v1624_v48 = vsub.f32 2.0, %v1560_v62  ;;  %2288 = vrcp.f32 %v1337_v63 }
 0x2b1   :  { %2290 = vpow2.f32 %v1284_v55 }
 0x2b2   :  { %v3445_v13 = vpop.eup %2284  ;;  %v1688_v45 = vmul.f32 %v2283_v22, %v1624_v48 }
 0x2b3   :  { %v1383_v7 = vsel %vm905_vm2, %v3445_v13, 0.0 }
 0x2b4   :  { %v1752_v4 = vmul.f32 %v3114_v17, %v1688_v45  ;;  %1384 = vadd.xlane.f32.xlu2 %v1383_v7  ;;  %v2287_v26 = vpop.eup %2286  ;;  %v3722_v17 = vld [vmem:[#allocation19_spill] sm:$0xff] }
 0x2b5   :  { %v1592_v39 = vmul.f32 %v2287_v26, %v1430_v24  ;;  %v1004_v40 = vpop.xlane.xlu2 %1003  ;;  %v1160_v21 = vsub.f32 %v3722_v17, %v1094_v30  ;;  %v1161_v30 = vsub.f32 %v3148_v25, %v1097_v44 }
 0x2b6   :  { %v2289_v12 = vpop.eup %2288  ;;  %1816 = vst.msk [vmem:[%s3668_s5 + $0x70] sm:$0xff] %vm905_vm2, %v1752_v4  ;;  %v1433_v16 = vpop.xlane.xlu0 %1432  ;;  %v1130_v9 = vsub.f32 %v3166_v43, %v1004_v40 }
 0x2b7   :  { %v1561_v14 = vmul.f32 %v2289_v12, %v1337_v63  ;;  %v1436_v52 = vpop.xlane.xlu1 %1435  ;;  %2292 = vrcp.f32 %v1433_v16  ;;  %v3455_v37 = vpop.eup %2290  ;;  %v1656_v58 = vsub.f32 2.0, %v1592_v39  ;;  %v1286_v56 = vmul.f32 1.442695, %v1160_v21 }
 0x2b8   :  { %2294 = vrcp.f32 %v1436_v52  ;;  %v1226_v57 = vmul.f32 1.442695, %v1130_v9  ;;  %v1473_v18 = vsel %vm905_vm2, %v3455_v37, 0.0  ;;  %v1288_v44 = vmul.f32 1.442695, %v1161_v30 }
 0x2b9   :  { %v1625_v61 = vsub.f32 2.0, %v1561_v14  ;;  %v1720_v35 = vmul.f32 %v2287_v26, %v1656_v58 }
 0x2ba   :  { %2296 = vpow2.f32 %v1226_v57 }
 0x2bb   :  { %v1689_v28 = vmul.f32 %v2289_v12, %v1625_v61  ;;  %v1784_v22 = vmul.f32 %v3138_v59, %v1720_v35 }
 0x2bc   :  { %1474 = vadd.xlane.f32.xlu2 %v1473_v18 }
 0x2bd   :  { %v2293_v43 = vpop.eup %2292  ;;  %v1753_v55 = vmul.f32 %v3154_v32, %v1689_v28  ;;  %1848 = vst.msk [vmem:[%s3668_s5 + $0x170] sm:$0xff] %vm905_vm2, %v1784_v22  ;;  %v1340_v63 = vpop.xlane.xlu2 %1339 }
 0x2be   :  { %v2295_v62 = vpop.eup %2294  ;;  %v1593_v24 = vmul.f32 %v2293_v43, %v1433_v16  ;;  %v1007_v48 = vpop.xlane.xlu0 %1006  ;;  %2298 = vrcp.f32 %v1340_v63 }
 0x2bf   :  { %1817 = vst.msk [vmem:[%s3668_s5 + $0x78] sm:$0xff] %vm905_vm2, %v1753_v55  ;;  %v1594_v59 = vmul.f32 %v2295_v62, %v1436_v52  ;;  %v1346_v45 = vpop.xlane.xlu1 %1345  ;;  %v1131_v32 = vsub.f32 %v3197_v47, %v1007_v48 }
 0x2c0   :  { %v1657_v7 = vsub.f32 2.0, %v1593_v24  ;;  %2300 = vrcp.f32 %v1346_v45  ;;  %v3472_v4 = vpop.eup %2296 }
 0x2c1   :  { %2302 = vpow2.f32 %v1286_v56  ;;  %v1658_v26 = vsub.f32 2.0, %v1594_v59  ;;  %v1228_v25 = vmul.f32 1.442695, %v1131_v32  ;;  %v1386_v39 = vsel %vm905_vm2, %v3472_v4, 0.0 }
 0x2c2   :  { %v1721_v12 = vmul.f32 %v2293_v43, %v1657_v7  ;;  %1387 = vadd.xlane.f32.xlu0 %v1386_v39 }
 0x2c3   :  { %v1722_v40 = vmul.f32 %v2295_v62, %v1658_v26  ;;  %2304 = vpow2.f32 %v1228_v25 }
 0x2c4   :  { %v1785_v16 = vmul.f32 %v3173_v60, %v1721_v12  ;;  %v2299_v14 = vpop.eup %2298  ;;  %2306 = vpow2.f32 %v1288_v44 }
 0x2c5   :  { %v1786_v47 = vmul.f32 %v3179_v49, %v1722_v40  ;;  %v1562_v52 = vmul.f32 %v2299_v14, %v1340_v63  ;;  %v1439_v58 = vpop.xlane.xlu2 %1438 }
 0x2c6   :  { %v2301_v9 = vpop.eup %2300  ;;  %1849 = vst.msk [vmem:[%s3668_s5 + $0x178] sm:$0xff] %vm905_vm2, %v1785_v16  ;;  %v1343_v17 = vpop.xlane.xlu0 %1342  ;;  %2308 = vrcp.f32 %v1439_v58 }
 0x2c7   :  { %v3482_v21 = vpop.eup %2302  ;;  %1850 = vst.msk [vmem:[%s3668_s5 + $0x180] sm:$0xff] %vm905_vm2, %v1786_v47  ;;  %v1564_v60 = vmul.f32 %v2301_v9, %v1346_v45  ;;  %v1445_v49 = vpop.xlane.xlu1 %1444  ;;  %v1626_v61 = vsub.f32 2.0, %v1562_v52 }
 0x2c8   :  { %2310 = vrcp.f32 %v1445_v49  ;;  %v1476_v18 = vsel %vm905_vm2, %v3482_v21, 0.0 }
 0x2c9   :  { %v3488_v57 = vpop.eup %2304  ;;  %v1628_v35 = vsub.f32 2.0, %v1564_v60  ;;  %2312 = vrcp.f32 %v1343_v17  ;;  %v1690_v28 = vmul.f32 %v2299_v14, %v1626_v61 }
 0x2ca   :  { %v1389_v22 = vsel %vm905_vm2, %v3488_v57, 0.0  ;;  %1477 = vadd.xlane.f32.xlu0 %v1476_v18  ;;  %v3494_v56 = vpop.eup %2306 }
 0x2cb   :  { %v1692_v43 = vmul.f32 %v2301_v9, %v1628_v35  ;;  %1390 = vadd.xlane.f32.xlu1 %v1389_v22  ;;  %v1754_v55 = vmul.f32 %v3193_v19, %v1690_v28  ;;  %v1479_v12 = vsel %vm905_vm2, %v3494_v56, 0.0 }
 0x2cc   :  { %v2309_v62 = vpop.eup %2308 }
 0x2cd   :  { %v1756_v30 = vmul.f32 %v3209_v6, %v1692_v43  ;;  %1818 = vst.msk [vmem:[%s3668_s5 + $0x80] sm:$0xff] %vm905_vm2, %v1754_v55  ;;  %v1595_v63 = vmul.f32 %v2309_v62, %v1439_v58  ;;  %v1349_v48 = vpop.xlane.xlu2 %1348 }
 0x2ce   :  { %v2311_v24 = vpop.eup %2310  ;;  %v1442_v59 = vpop.xlane.xlu0 %1441  ;;  %2314 = vrcp.f32 %v1349_v48 }
 0x2cf   :  { %v2313_v45 = vpop.eup %2312  ;;  %1820 = vst.msk [vmem:[%s3668_s5 + $0x90] sm:$0xff] %vm905_vm2, %v1756_v30  ;;  %v1597_v32 = vmul.f32 %v2311_v24, %v1445_v49  ;;  %v1355_v19 = vpop.xlane.xlu1 %1354  ;;  %v1659_v7 = vsub.f32 2.0, %v1595_v63 }
 0x2d0   :  { %v1563_v6 = vmul.f32 %v2313_v45, %v1343_v17  ;;  %2316 = vrcp.f32 %v1355_v19 }
 0x2d1   :  { %v1661_v26 = vsub.f32 2.0, %v1597_v32  ;;  %2318 = vrcp.f32 %v1442_v59  ;;  %v1723_v25 = vmul.f32 %v2309_v62, %v1659_v7 }
 0x2d2   :  { %v1627_v44 = vsub.f32 2.0, %v1563_v6 }
 0x2d3   :  { %v1725_v39 = vmul.f32 %v2311_v24, %v1661_v26  ;;  %1480 = vadd.xlane.f32.xlu1 %v1479_v12  ;;  %v1787_v40 = vmul.f32 %v3228_v51, %v1723_v25 }
 0x2d4   :  { %v1691_v16 = vmul.f32 %v2313_v45, %v1627_v44  ;;  %v2315_v14 = vpop.eup %2314 }
 0x2d5   :  { %v1789_v47 = vmul.f32 %v3234_v31, %v1725_v39  ;;  %1851 = vst.msk [vmem:[%s3668_s5 + $0x188] sm:$0xff] %vm905_vm2, %v1787_v40  ;;  %v1565_v58 = vmul.f32 %v2315_v14, %v1349_v48  ;;  %v1448_v17 = vpop.xlane.xlu2 %1447 }
 0x2d6   :  { %v2317_v9 = vpop.eup %2316  ;;  %v1755_v52 = vmul.f32 %v3222_v0, %v1691_v16  ;;  %v1352_v60 = vpop.xlane.xlu0 %1351  ;;  %2320 = vrcp.f32 %v1448_v17 }
 0x2d7   :  { %v2319_v49 = vpop.eup %2318  ;;  %1853 = vst.msk [vmem:[%s3668_s5 + $0x198] sm:$0xff] %vm905_vm2, %v1789_v47  ;;  %v1567_v51 = vmul.f32 %v2317_v9, %v1355_v19  ;;  %v1454_v31 = vpop.xlane.xlu1 %1453  ;;  %v1629_v61 = vsub.f32 2.0, %v1565_v58 }
 0x2d8   :  { %1819 = vst.msk [vmem:[%s3668_s5 + $0x88] sm:$0xff] %vm905_vm2, %v1755_v52  ;;  %v1596_v35 = vmul.f32 %v2319_v49, %v1442_v59  ;;  %2322 = vrcp.f32 %v1454_v31 }
 0x2d9   :  { %v1631_v0 = vsub.f32 2.0, %v1567_v51  ;;  %2324 = vrcp.f32 %v1352_v60  ;;  %v1693_v28 = vmul.f32 %v2315_v14, %v1629_v61 }
 0x2da   :  { %v1660_v18 = vsub.f32 2.0, %v1596_v35 }
 0x2db   :  { %v1695_v22 = vmul.f32 %v2317_v9, %v1631_v0  ;;  %v1757_v43 = vmul.f32 %v3256_v34, %v1693_v28 }
 0x2dc   :  { %v1724_v55 = vmul.f32 %v2319_v49, %v1660_v18  ;;  %v2321_v62 = vpop.eup %2320 }
 0x2dd   :  { %v1759_v30 = vmul.f32 %v3258_v42, %v1695_v22  ;;  %1821 = vst.msk [vmem:[%s3668_s5 + $0x98] sm:$0xff] %vm905_vm2, %v1757_v43  ;;  %v1598_v48 = vmul.f32 %v2321_v62, %v1448_v17  ;;  %v1358_v59 = vpop.xlane.xlu2 %1357 }
 0x2de   :  { %v2323_v24 = vpop.eup %2322  ;;  %v1788_v63 = vmul.f32 %v3247_v3, %v1724_v55  ;;  %v1451_v45 = vpop.xlane.xlu0 %1450  ;;  %2326 = vrcp.f32 %v1358_v59 }
 0x2df   :  { %v2325_v32 = vpop.eup %2324  ;;  %1823 = vst.msk [vmem:[%s3668_s5 + $0xa8] sm:$0xff] %vm905_vm2, %v1759_v30  ;;  %v1600_v34 = vmul.f32 %v2323_v24, %v1454_v31  ;;  %v1364_v42 = vpop.xlane.xlu1 %1363  ;;  %v1662_v19 = vsub.f32 2.0, %v1598_v48 }
 0x2e0   :  { %1852 = vst.msk [vmem:[%s3668_s5 + $0x190] sm:$0xff] %vm905_vm2, %v1788_v63  ;;  %v1566_v7 = vmul.f32 %v2325_v32, %v1352_v60  ;;  %2328 = vrcp.f32 %v1364_v42 }
 0x2e1   :  { %v1664_v3 = vsub.f32 2.0, %v1600_v34  ;;  %2330 = vrcp.f32 %v1451_v45  ;;  %v1726_v6 = vmul.f32 %v2321_v62, %v1662_v19 }
 0x2e2   :  { %v1630_v26 = vsub.f32 2.0, %v1566_v7 }
 0x2e3   :  { %v1728_v25 = vmul.f32 %v2323_v24, %v1664_v3  ;;  %v1790_v44 = vmul.f32 %v3276_v10, %v1726_v6 }
 0x2e4   :  { %v1694_v12 = vmul.f32 %v2325_v32, %v1630_v26  ;;  %v2327_v39 = vpop.eup %2326 }
 0x2e5   :  { %v1792_v40 = vmul.f32 %v3283_v29, %v1728_v25  ;;  %1854 = vst.msk [vmem:[%s3668_s5 + $0x1a0] sm:$0xff] %vm905_vm2, %v1790_v44  ;;  %v1568_v47 = vmul.f32 %v2327_v39, %v1358_v59  ;;  %v1457_v9 = vpop.xlane.xlu2 %1456 }
 0x2e6   :  { %v2329_v16 = vpop.eup %2328  ;;  %v1758_v14 = vmul.f32 %v3270_v11, %v1694_v12  ;;  %v1361_v52 = vpop.xlane.xlu0 %1360  ;;  %2332 = vrcp.f32 %v1457_v9 }
 0x2e7   :  { %v2331_v58 = vpop.eup %2330  ;;  %1856 = vst.msk [vmem:[%s3668_s5 + $0x1b0] sm:$0xff] %vm905_vm2, %v1792_v40  ;;  %v1570_v10 = vmul.f32 %v2329_v16, %v1364_v42  ;;  %v1632_v29 = vsub.f32 2.0, %v1568_v47  ;;  %2334 = vrcp.f32 %v1361_v52 }
 0x2e8   :  { %1822 = vst.msk [vmem:[%s3668_s5 + $0xa0] sm:$0xff] %vm905_vm2, %v1758_v14  ;;  %v1599_v17 = vmul.f32 %v2331_v58, %v1451_v45 }
 0x2e9   :  { %v1634_v11 = vsub.f32 2.0, %v1570_v10  ;;  %v1696_v60 = vmul.f32 %v2327_v39, %v1632_v29 }
 0x2ea   :  { %v1663_v49 = vsub.f32 2.0, %v1599_v17 }
 0x2eb   :  { %v1698_v51 = vmul.f32 %v2329_v16, %v1634_v11  ;;  %v1760_v31 = vmul.f32 %v3300_v46, %v1696_v60 }
 0x2ec   :  { %v1727_v61 = vmul.f32 %v2331_v58, %v1663_v49  ;;  %v2333_v35 = vpop.eup %2332 }
 0x2ed   :  { %v1762_v0 = vmul.f32 %v3303_v23, %v1698_v51  ;;  %v2335_v28 = vpop.eup %2334  ;;  %1824 = vst.msk [vmem:[%s3668_s5 + $0xb0] sm:$0xff] %vm905_vm2, %v1760_v31  ;;  %v1601_v22 = vmul.f32 %v2333_v35, %v1457_v9  ;;  %v1367_v43 = vpop.xlane.xlu2 %1366 }
 0x2ee   :  { %v1791_v18 = vmul.f32 %v3293_v54, %v1727_v61  ;;  %v1460_v55 = vpop.xlane.xlu0 %1459  ;;  %v1569_v46 = vmul.f32 %v2335_v28, %v1361_v52  ;;  %2336 = vrcp.f32 %v1367_v43  ;;  %v1463_v62 = vpop.xlane.xlu1 %1462 }
 0x2ef   :  { %1826 = vst.msk [vmem:[%s3668_s5 + $0xc0] sm:$0xff] %vm905_vm2, %v1762_v0  ;;  %v1665_v23 = vsub.f32 2.0, %v1601_v22  ;;  %2338 = vrcp.f32 %v1463_v62 }
 0x2f0   :  { %1855 = vst.msk [vmem:[%s3668_s5 + $0x1a8] sm:$0xff] %vm905_vm2, %v1791_v18  ;;  %v1633_v30 = vsub.f32 2.0, %v1569_v46  ;;  %2340 = vrcp.f32 %v1460_v55 }
 0x2f1   :  { %v1729_v54 = vmul.f32 %v2333_v35, %v1665_v23 }
 0x2f2   :  { %v1697_v24 = vmul.f32 %v2335_v28, %v1633_v30 }
 0x2f3   :  { %v1793_v63 = vmul.f32 %v3320_v8, %v1729_v54 }
 0x2f4   :  { %v2337_v48 = vpop.eup %2336  ;;  %v1761_v59 = vmul.f32 %v3314_v2, %v1697_v24 }
 0x2f5   :  { %v2339_v45 = vpop.eup %2338  ;;  %1857 = vst.msk [vmem:[%s3668_s5 + $0x1b8] sm:$0xff] %vm905_vm2, %v1793_v63  ;;  %v1571_v32 = vmul.f32 %v2337_v48, %v1367_v43 }
 0x2f6   :  { %v1370_v34 = vpop.xlane.xlu0 %1369  ;;  %v2341_v42 = vpop.eup %2340  ;;  %1825 = vst.msk [vmem:[%s3668_s5 + $0xb8] sm:$0xff] %vm905_vm2, %v1761_v59  ;;  %v1603_v19 = vmul.f32 %v2339_v45, %v1463_v62 }
 0x2f7   :  { %v1466_v7 = vpop.xlane.xlu2 %1465  ;;  %2342 = vrcp.f32 %v1370_v34  ;;  %v1635_v8 = vsub.f32 2.0, %v1571_v32  ;;  %v1602_v3 = vmul.f32 %v2341_v42, %v1460_v55 }
 0x2f8   :  { %2344 = vrcp.f32 %v1466_v7  ;;  %v1667_v2 = vsub.f32 2.0, %v1603_v19 }
 0x2f9   :  { %v1699_v6 = vmul.f32 %v2337_v48, %v1635_v8  ;;  %v1666_v26 = vsub.f32 2.0, %v1602_v3 }
 0x2fa   :  { %v1731_v25 = vmul.f32 %v2339_v45, %v1667_v2 }
 0x2fb   :  { %v1763_v44 = vmul.f32 %v3338_v38, %v1699_v6  ;;  %v1730_v12 = vmul.f32 %v2341_v42, %v1666_v26 }
 0x2fc   :  { %v1795_v40 = vmul.f32 %v3342_v36, %v1731_v25 }
 0x2fd   :  { %v2343_v39 = vpop.eup %2342  ;;  %1827 = vst.msk [vmem:[%s3668_s5 + $0xc8] sm:$0xff] %vm905_vm2, %v1763_v44  ;;  %v1794_v14 = vmul.f32 %v3331_v5, %v1730_v12 }
 0x2fe   :  { %v2345_v16 = vpop.eup %2344  ;;  %v1572_v47 = vmul.f32 %v2343_v39, %v1370_v34  ;;  %v1373_v9 = vpop.xlane.xlu1 %1372  ;;  %1859 = vst.msk [vmem:[%s3668_s5 + $0x1c8] sm:$0xff] %vm905_vm2, %v1795_v40 }
 0x2ff   :  { %v1604_v38 = vmul.f32 %v2345_v16, %v1466_v7  ;;  %2346 = vrcp.f32 %v1373_v9  ;;  %1858 = vst.msk [vmem:[%s3668_s5 + $0x1c0] sm:$0xff] %vm905_vm2, %v1794_v14 }
 0x300   :  { %v1636_v36 = vsub.f32 2.0, %v1572_v47 }
 0x301   :  { %v1668_v52 = vsub.f32 2.0, %v1604_v38 }
 0x302   :  { %v1700_v58 = vmul.f32 %v2343_v39, %v1636_v36 }
 0x303   :  { %v1732_v10 = vmul.f32 %v2345_v16, %v1668_v52 }
 0x304   :  { %v1764_v5 = vmul.f32 %v3361_v41, %v1700_v58 }
 0x305   :  { %v2347_v29 = vpop.eup %2346  ;;  %v1796_v17 = vmul.f32 %v3363_v33, %v1732_v10  ;;  %v1469_v60 = vpop.xlane.xlu0 %1468 }
 0x306   :  { %1828 = vst.msk [vmem:[%s3668_s5 + $0xd0] sm:$0xff] %vm905_vm2, %v1764_v5  ;;  %v1573_v11 = vmul.f32 %v2347_v29, %v1373_v9  ;;  %2348 = vrcp.f32 %v1469_v60 }
 0x307   :  { %1860 = vst.msk [vmem:[%s3668_s5 + $0x1d0] sm:$0xff] %vm905_vm2, %v1796_v17  ;;  %v1376_v49 = vpop.xlane.xlu2 %1375 }
 0x308   :  { %v1637_v51 = vsub.f32 2.0, %v1573_v11  ;;  %2350 = vrcp.f32 %v1376_v49 }
 0x30a   :  { %v1701_v41 = vmul.f32 %v2347_v29, %v1637_v51 }
 0x30c   :  { %v1765_v31 = vmul.f32 %v3376_v20, %v1701_v41  ;;  %v2349_v33 = vpop.eup %2348 }
 0x30d   :  { %v1605_v35 = vmul.f32 %v2349_v33, %v1469_v60 }
 0x30e   :  { %v2351_v61 = vpop.eup %2350  ;;  %1829 = vst.msk [vmem:[%s3668_s5 + $0xd8] sm:$0xff] %vm905_vm2, %v1765_v31  ;;  %v1472_v0 = vpop.xlane.xlu1 %1471 }
 0x30f   :  { %v1574_v28 = vmul.f32 %v2351_v61, %v1376_v49  ;;  %2352 = vrcp.f32 %v1472_v0  ;;  %v1669_v18 = vsub.f32 2.0, %v1605_v35 }
 0x311   :  { %v1638_v22 = vsub.f32 2.0, %v1574_v28  ;;  %v1733_v43 = vmul.f32 %v2349_v33, %v1669_v18 }
 0x313   :  { %v1702_v55 = vmul.f32 %v2351_v61, %v1638_v22  ;;  %v1797_v46 = vmul.f32 %v3391_v50, %v1733_v43 }
 0x315   :  { %v2353_v62 = vpop.eup %2352  ;;  %v1766_v20 = vmul.f32 %v3393_v15, %v1702_v55  ;;  %1861 = vst.msk [vmem:[%s3668_s5 + $0x1d8] sm:$0xff] %vm905_vm2, %v1797_v46  ;;  %v1379_v30 = vpop.xlane.xlu0 %1378 }
 0x316   :  { %v1606_v23 = vmul.f32 %v2353_v62, %v1472_v0  ;;  %2354 = vrcp.f32 %v1379_v30 }
 0x317   :  { %1830 = vst.msk [vmem:[%s3668_s5 + $0xe0] sm:$0xff] %vm905_vm2, %v1766_v20 }
 0x318   :  { %v1670_v54 = vsub.f32 2.0, %v1606_v23 }
 0x31a   :  { %v1734_v24 = vmul.f32 %v2353_v62, %v1670_v54 }
 0x31c   :  { %v1798_v50 = vmul.f32 %v3405_v1, %v1734_v24  ;;  %v2355_v63 = vpop.eup %2354 }
 0x31d   :  { %v1575_v15 = vmul.f32 %v2355_v63, %v1379_v30 }
 0x31e   :  { %1862 = vst.msk [vmem:[%s3668_s5 + $0x1e0] sm:$0xff] %vm905_vm2, %v1798_v50  ;;  %v1382_v48 = vpop.xlane.xlu1 %1381 }
 0x31f   :  { %2356 = vrcp.f32 %v1382_v48  ;;  %v1639_v59 = vsub.f32 2.0, %v1575_v15 }
 0x321   :  { %v1703_v45 = vmul.f32 %v2355_v63, %v1639_v59 }
 0x323   :  { %v1767_v32 = vmul.f32 %v3420_v27, %v1703_v45 }
 0x325   :  { %v2357_v34 = vpop.eup %2356  ;;  %1831 = vst.msk [vmem:[%s3668_s5 + $0xe8] sm:$0xff] %vm905_vm2, %v1767_v32 }
 0x326   :  { %v1576_v1 = vmul.f32 %v2357_v34, %v1382_v48 }
 0x327   :  { %v1385_v42 = vpop.xlane.xlu2 %1384 }
 0x328   :  { %v1640_v19 = vsub.f32 2.0, %v1576_v1  ;;  %2358 = vrcp.f32 %v1385_v42 }
 0x32a   :  { %v1704_v7 = vmul.f32 %v2357_v34, %v1640_v19 }
 0x32c   :  { %v1768_v8 = vmul.f32 %v3430_v53, %v1704_v7 }
 0x32e   :  { %v2359_v3 = vpop.eup %2358  ;;  %1832 = vst.msk [vmem:[%s3668_s5 + $0xf0] sm:$0xff] %vm905_vm2, %v1768_v8 }
 0x32f   :  { %v1577_v27 = vmul.f32 %v2359_v3, %v1385_v42  ;;  %v1475_v2 = vpop.xlane.xlu2 %1474 }
 0x330   :  { %2360 = vrcp.f32 %v1475_v2 }
 0x331   :  { %v1641_v6 = vsub.f32 2.0, %v1577_v27 }
 0x333   :  { %v1705_v26 = vmul.f32 %v2359_v3, %v1641_v6 }
 0x335   :  { %v1769_v25 = vmul.f32 %v3445_v13, %v1705_v26  ;;  %v1388_v12 = vpop.xlane.xlu0 %1387 }
 0x336   :  { %v2361_v44 = vpop.eup %2360  ;;  %2362 = vrcp.f32 %v1388_v12 }
 0x337   :  { %1833 = vst.msk [vmem:[%s3668_s5 + $0xf8] sm:$0xff] %vm905_vm2, %v1769_v25  ;;  %v1607_v53 = vmul.f32 %v2361_v44, %v1475_v2 }
 0x339   :  { %v1671_v39 = vsub.f32 2.0, %v1607_v53 }
 0x33b   :  { %v1735_v40 = vmul.f32 %v2361_v44, %v1671_v39 }
 0x33c   :  { %v2363_v16 = vpop.eup %2362 }
 0x33d   :  { %v1799_v14 = vmul.f32 %v3455_v37, %v1735_v40  ;;  %v1578_v47 = vmul.f32 %v2363_v16, %v1388_v12  ;;  %v1478_v38 = vpop.xlane.xlu0 %1477 }
 0x33e   :  { %v1391_v9 = vpop.xlane.xlu1 %1390 }
 0x33f   :  { %1863 = vst.msk [vmem:[%s3668_s5 + $0x1e8] sm:$0xff] %vm905_vm2, %v1799_v14  ;;  %2364 = vrcp.f32 %v1391_v9  ;;  %v1642_v13 = vsub.f32 2.0, %v1578_v47 }
 0x340   :  { %2366 = vrcp.f32 %v1478_v38 }
 0x341   :  { %v1706_v36 = vmul.f32 %v2363_v16, %v1642_v13 }
 0x343   :  { %v1770_v52 = vmul.f32 %v3472_v4, %v1706_v36 }
 0x345   :  { %v2365_v58 = vpop.eup %2364  ;;  %1834 = vst.msk [vmem:[%s3668_s5 + $0x100] sm:$0xff] %vm905_vm2, %v1770_v52 }
 0x346   :  { %v2367_v10 = vpop.eup %2366  ;;  %v1579_v37 = vmul.f32 %v2365_v58, %v1391_v9  ;;  %v1481_v5 = vpop.xlane.xlu1 %1480 }
 0x347   :  { %v1608_v29 = vmul.f32 %v2367_v10, %v1478_v38  ;;  %2368 = vrcp.f32 %v1481_v5 }
 0x348   :  { %v1643_v17 = vsub.f32 2.0, %v1579_v37 }
 0x349   :  { %v1672_v11 = vsub.f32 2.0, %v1608_v29 }
 0x34a   :  { %v1707_v60 = vmul.f32 %v2365_v58, %v1643_v17 }
 0x34b   :  { %v1736_v49 = vmul.f32 %v2367_v10, %v1672_v11 }
 0x34c   :  { %v1771_v51 = vmul.f32 %v3488_v57, %v1707_v60 }
 0x34d   :  { %v2369_v41 = vpop.eup %2368  ;;  %v1800_v4 = vmul.f32 %v3482_v21, %v1736_v49 }
 0x34e   :  { %1835 = vst.msk [vmem:[%s3668_s5 + $0x108] sm:$0xff] %vm905_vm2, %v1771_v51  ;;  %v1609_v31 = vmul.f32 %v2369_v41, %v1481_v5 }
 0x34f   :  { %1864 = vst.msk [vmem:[%s3668_s5 + $0x1f0] sm:$0xff] %vm905_vm2, %v1800_v4 }
 0x350   :  { %v1673_v33 = vsub.f32 2.0, %v1609_v31 }
 0x352   :  { %v1737_v61 = vmul.f32 %v2369_v41, %v1673_v33 }
 0x354   :  { %v1801_v35 = vmul.f32 %v3494_v56, %v1737_v61 }
 0x356   :  { %1865 = vst.msk [vmem:[%s3668_s5 + $0x1f8] sm:$0xff] %vm905_vm2, %v1801_v35 }

</bundles_post_ra>
